<compile_context>
chip_gen: v6e
topology: v6e:2x2x1
jax: 0.10.0
libtpu: 0.0.40
codegen_flags: <defaults>
</compile_context>

<pallas_src>
import functools
import math

import jax
import jax.numpy as jnp
from jax import lax
from jax.experimental import pallas as pl
from jax.experimental.pallas import tpu as pltpu

VMEM = pltpu.MemorySpace.VMEM
SMEM = pltpu.MemorySpace.SMEM
LN_EPS = 1e-5  # PyTorch nn.LayerNorm default


def _bdot(x, w):
    """bf16 MXU matmul with f32 accumulation (same on kernel & reference path)."""
    return jnp.dot(x.astype(jnp.bfloat16), w.astype(jnp.bfloat16),
                   preferred_element_type=jnp.float32)


# ---------------------------------------------------------------------------
# Kernel 1: one hetenet block per grid step (grid = (L,), "parallel")
# ---------------------------------------------------------------------------
def hetenet_block_kernel(wf_ref, a_ref, feat_ref, sel_ref,
                         w1, b1, g1, be1,
                         w2, b2, g2, be2,
                         w3, b3, g3, be3,
                         drug_ref, side_ref, scores_ref):
    i = pl.program_id(0)
    # Cast A once, reuse for the three A @ y matmuls.
    A = a_ref[...].astype(jnp.bfloat16)

    def layer(x, w, b, g, be):
        y = _bdot(x, w[...]) + b[...]                       # Linear (bf16 MXU, f32 acc)
        mu = jnp.mean(y, axis=-1, keepdims=True)            # LayerNorm in f32
        var = jnp.mean((y - mu) * (y - mu), axis=-1, keepdims=True)
        y = (y - mu) * lax.rsqrt(var + LN_EPS) * g[...] + be[...]
        y = jnp.maximum(y, 0.0)                              # ReLU
        # TODO(synk): dropout (p=0.6) omitted -> eval semantics.
        return jnp.dot(A, y.astype(jnp.bfloat16),
                       preferred_element_type=jnp.float32)   # A @ y

    h1 = layer(feat_ref[...], w1, b1, g1, be1)
    h2 = layer(h1, w2, b2, g2, be2)
    h3 = layer(h2, w3, b3, g3, be3)
    info = wf_ref[i, 0] * h1 + wf_ref[i, 1] * h2 + wf_ref[i, 2] * h3

    # drug_index gather as a one-hot matmul (exact selection, MXU-friendly,
    # avoids dynamic gather lowering).
    drug_emd = jnp.dot(sel_ref[...], info, preferred_element_type=jnp.float32)
    side_emd = info[info.shape[0] - side_ref.shape[0]:, :]

    # Concatenation across blocks happens for free via the out BlockSpec (0, i).
    drug_ref[...] = drug_emd
    side_ref[...] = side_emd

    # Per-block score: drug_emd @ side_emd.T (bf16 operands, f32 acc).
    # NOTE: RHS transpose is an XLU op; negligible at these sizes — for large
    # side_num, keep side embeddings stored as (D, S) instead.
    scores_ref[...] = lax.dot_general(
        drug_emd.astype(jnp.bfloat16), side_emd.astype(jnp.bfloat16),
        (((1,), (1,)), ((), ())), preferred_element_type=jnp.float32)


def hetenet_blocks_forward(p, inm_stack, feat_stack, sel, drug_num):
    L, N, _ = inm_stack.shape
    in_dim = feat_stack.shape[2]
    D = p["w1"].shape[-1]
    n_sel = sel.shape[0]
    side_num = N - drug_num

    def stacked(shape):  # leading L-dim squeezed, indexed by the grid step
        return pl.BlockSpec((None,) + shape, lambda i: (i,) + (0,) * len(shape))

    in_specs = [
        pl.BlockSpec(memory_space=SMEM),                 # wf (L, 3), whole array
        stacked((N, N)),                                 # A
        stacked((N, in_dim)),                            # features
        pl.BlockSpec((n_sel, N), lambda i: (0, 0)),      # one-hot drug selector
    ]
    for fi in (in_dim, D, D):
        in_specs += [stacked((fi, D)),                   # W
                     stacked((1, D)),                    # b
                     stacked((1, D)),                    # LN gamma
                     stacked((1, D))]                    # LN beta

    out_specs = [
        pl.BlockSpec((n_sel, D), lambda i: (0, i)),                  # drug slab
        pl.BlockSpec((side_num, D), lambda i: (0, i)),               # side slab
        pl.BlockSpec((None, n_sel, side_num), lambda i: (i, 0, 0)),  # per-block scores
    ]
    out_shape = (
        jax.ShapeDtypeStruct((n_sel, L * D), jnp.float32),
        jax.ShapeDtypeStruct((side_num, L * D), jnp.float32),
        jax.ShapeDtypeStruct((L, n_sel, side_num), jnp.float32),
    )

    return pl.pallas_call(
        hetenet_block_kernel,
        grid=(L,),
        in_specs=in_specs,
        out_specs=out_specs,
        out_shape=out_shape,
        compiler_params=pltpu.CompilerParams(
            dimension_semantics=("parallel",)),          # 2nd TC on v7x
    )(p["wf"], inm_stack, feat_stack, sel,
      p["w1"], p["b1"], p["g1"], p["be1"],
      p["w2"], p["b2"], p["g2"], p["be2"],
      p["w3"], p["b3"], p["g3"], p["be3"])


# ---------------------------------------------------------------------------
# Kernel 2: fused tail (avg, fusion MLPs, scores_cat, final score, BCE loss)
# ---------------------------------------------------------------------------
def tail_kernel(pw_ref, scores_all_ref, drug_cat_ref, side_cat_ref,
                dw1, db1, dw2, db2,
                sw1, sb1, sw2, sb2,
                label_ref, scores_ref, loss_ref):
    L = scores_all_ref.shape[0]
    acc = scores_all_ref[0]
    for j in range(1, L):          # tiny static trip-count
        acc = acc + scores_all_ref[j]
    scores_avg = acc * (1.0 / L)

    def mlp(x, wa, ba, wb, bb):
        h = jnp.maximum(_bdot(x, wa[...]) + ba[...], 0.0)
        # TODO(synk): dropout (p=0.5) omitted -> eval semantics.
        return _bdot(h, wb[...]) + bb[...]

    drug_total = mlp(drug_cat_ref[...], dw1, db1, dw2, db2)
    side_total = mlp(side_cat_ref[...], sw1, sb1, sw2, sb2)
    scores_cat = lax.dot_general(
        drug_total.astype(jnp.bfloat16), side_total.astype(jnp.bfloat16),
        (((1,), (1,)), ((), ())), preferred_element_type=jnp.float32)

    scores = (scores_avg + scores_cat) * 0.5
    scores_ref[...] = scores

    # pos-weighted BCE-with-logits, numerically stable softplus(-x).
    y = jnp.where(label_ref[...] != 0.0, 1.0, 0.0)
    pw = pw_ref[0]
    softplus_neg = jnp.maximum(-scores, 0.0) + jnp.log(1.0 + jnp.exp(-jnp.abs(scores)))
    l = (1.0 - y) * scores + (1.0 + (pw - 1.0) * y) * softplus_neg
    loss_ref[0, 0] = jnp.sum(l) * (1.0 / l.size)   # mean over true element count


def tail_forward(mlp_d, mlp_s, scores_all, drug_cat, side_cat, label2d, pos_weight):
    _, n_sel, side_num = scores_all.shape
    pw = jnp.asarray(pos_weight, jnp.float32).reshape(1)
    scores, loss = pl.pallas_call(
        tail_kernel,
        out_shape=(jax.ShapeDtypeStruct((n_sel, side_num), jnp.float32),
                   jax.ShapeDtypeStruct((1, 1), jnp.float32)),
        in_specs=[pl.BlockSpec(memory_space=SMEM)]
                 + [pl.BlockSpec(memory_space=VMEM)] * 12,
        out_specs=(pl.BlockSpec(memory_space=VMEM),
                   pl.BlockSpec(memory_space=SMEM)),
    )(pw, scores_all, drug_cat, side_cat,
      mlp_d["w1"], mlp_d["b1"], mlp_d["w2"], mlp_d["b2"],
      mlp_s["w1"], mlp_s["b1"], mlp_s["w2"], mlp_s["b2"],
      label2d)
    return scores, loss[0, 0]


# ---------------------------------------------------------------------------
# Forward (glue is jitted; all heavy math in the two Pallas kernels)
# ---------------------------------------------------------------------------
@functools.partial(jax.jit, static_argnames=("drug_num", "training"))
def _forward_core(params, inm_stack, feat_stack, drug_index, true_label,
                  pos_weight, drug_num, training):
    L, N, _ = inm_stack.shape
    n_sel = drug_index.shape[0]
    side_num = N - drug_num

    sel = jax.nn.one_hot(drug_index, N, dtype=jnp.float32)   # (n_sel, N)
    drug_cat, side_cat, scores_all = hetenet_blocks_forward(
        params["blocks"], inm_stack, feat_stack, sel, drug_num)

    label2d = true_label.astype(jnp.float32).reshape(n_sel, side_num)
    scores, loss = tail_forward(params["drug_mlp"], params["side_mlp"],
                                scores_all, drug_cat, side_cat, label2d,
                                pos_weight)
    if training:
        return scores.reshape(-1), loss
    return scores


def my_model_forward(params, data_list, drug_index, true_label, drug_num,
                     training=True, pos_weight=20.0):
    _drug_sim, _side_sim, inm_list, feat_list, _origin = data_list
    inm_stack = jnp.stack(inm_list)      # (L, N, N)
    feat_stack = jnp.stack(feat_list)    # (L, N, input_dim)
    return _forward_core(params, inm_stack, feat_stack, drug_index, true_label,
                         jnp.float32(pos_weight),
                         drug_num=drug_num, training=training)


# ---------------------------------------------------------------------------
# Parameter construction (deterministic; nn.Linear / LayerNorm shapes, stacked
# over the L hetenet blocks)
# ---------------------------------------------------------------------------
def linear_params(key, fan_in, fan_out, batch=()):
    k1, k2 = jax.random.split(key)
    bound = 1.0 / math.sqrt(fan_in)
    w = jax.random.uniform(k1, batch + (fan_in, fan_out), jnp.float32, -bound, bound)
    b = jax.random.uniform(k2, batch + (1, fan_out), jnp.float32, -bound, bound)
    return w, b


def make_block_params(key, L, input_dim, out_dim):
    keys = jax.random.split(key, 3)
    p = {"wf": jnp.tile(jnp.array([[0.5, 0.33, 0.25]], jnp.float32), (L, 1))}
    dims = [(input_dim, out_dim), (out_dim, out_dim), (out_dim, out_dim)]
    for n, (fi, fo) in enumerate(dims, start=1):
        w, b = linear_params(keys[n - 1], fi, fo, batch=(L,))
        p[f"w{n}"] = w
        p[f"b{n}"] = b
        p[f"g{n}"] = jnp.ones((L, 1, fo), jnp.float32)    # LayerNorm gamma
        p[f"be{n}"] = jnp.zeros((L, 1, fo), jnp.float32)  # LayerNorm beta
    return p


def make_mlp_params(key, in_dim, out_dim):
    k1, k2 = jax.random.split(key)
    w1, b1 = linear_params(k1, in_dim, out_dim)
    w2, b2 = linear_params(k2, out_dim, out_dim)
    return {"w1": w1, "b1": b1, "w2": w2, "b2": b2}


# ---------------------------------------------------------------------------
# Pure-JAX reference (mirrors the bf16-cast matmul structure)
# ---------------------------------------------------------------------------
def _ref_forward(params, inm_stack, feat_stack, drug_index, true_label,
                 drug_num, pos_weight=20.0):
    p = params["blocks"]
    L = inm_stack.shape[0]
    d, s, sc = [], [], []
    for i in range(L):
        A = inm_stack[i].astype(jnp.bfloat16)

        def layer(x, w, b, g, be):
            y = _bdot(x, w) + b
            mu = jnp.mean(y, -1, keepdims=True)
            var = jnp.mean((y - mu) ** 2, -1, keepdims=True)
            y = (y - mu) * lax.rsqrt(var + LN_EPS) * g + be
            y = jnp.maximum(y, 0.0)
            return jnp.dot(A, y.astype(jnp.bfloat16),
                           preferred_element_type=jnp.float32)

        h1 = layer(feat_stack[i], p["w1"][i], p["b1"][i], p["g1"][i], p["be1"][i])
        h2 = layer(h1, p["w2"][i], p["b2"][i], p["g2"][i], p["be2"][i])
        h3 = layer(h2, p["w3"][i], p["b3"][i], p["g3"][i], p["be3"][i])
        info = p["wf"][i, 0] * h1 + p["wf"][i, 1] * h2 + p["wf"][i, 2] * h3
        de = info[:drug_num][drug_index]
        fe = info[drug_num:]
        d.append(de); s.append(fe); sc.append(_bdot(de, fe.T))
    avg = sum(sc) / float(L)

    def mlp(x, mp):
        h = jnp.maximum(_bdot(x, mp["w1"]) + mp["b1"], 0.0)
        return _bdot(h, mp["w2"]) + mp["b2"]

    dt = mlp(jnp.concatenate(d, 1), params["drug_mlp"])
    st = mlp(jnp.concatenate(s, 1), params["side_mlp"])
    scores = (avg + _bdot(dt, st.T)) / 2.0
    x = scores.reshape(-1)
    y = jnp.where(true_label != 0, 1.0, 0.0)
    sp = jnp.maximum(-x, 0.0) + jnp.log(1.0 + jnp.exp(-jnp.abs(x)))
    loss = jnp.mean((1.0 - y) * x + (1.0 + (pos_weight - 1.0) * y) * sp)
    return x, loss


# ---------------------------------------------------------------------------
if __name__ == "__main__":
    # Small, module-consistent shapes (emd_dim = 128 keeps activations lane-dense).
    drug_num, side_num = 8, 8
    emd_dim = 128
    drug_feats, side_feats = 1, 2
    hete_layers = drug_feats * side_feats          # L = 2
    N = drug_num + side_num                        # 16
    input_dim = N                                  # hetenet input_dim

    root = jax.random.PRNGKey(0)
    k_param, k_data = jax.random.split(root)
    k_blocks, k_dmlp, k_smlp = jax.random.split(k_param, 3)

    params = {
        "blocks": make_block_params(k_blocks, hete_layers, input_dim, emd_dim),
        "drug_mlp": make_mlp_params(k_dmlp, emd_dim * hete_layers, emd_dim),
        "side_mlp": make_mlp_params(k_smlp, emd_dim * hete_layers, emd_dim),
    }

    dkeys = jax.random.split(k_data, 2 * hete_layers + 1)
    inm_list = [jax.random.normal(dkeys[i], (N, N), jnp.float32)
                for i in range(hete_layers)]
    feat_list = [jax.random.normal(dkeys[hete_layers + i], (N, input_dim), jnp.float32)
                 for i in range(hete_layers)]
    drug_index = jnp.array([0, 2, 5, 7], dtype=jnp.int32)
    true_label = (jax.random.uniform(dkeys[-1], (drug_index.shape[0] * side_num,))
                  > 0.8).astype(jnp.float32)

    data_list = (None, None, inm_list, feat_list, None)

    scores, loss = my_model_forward(params, data_list, drug_index, true_label,
                                    drug_num, training=True)
    jax.block_until_ready((scores, loss))

    ref_scores, ref_loss = _ref_forward(params, jnp.stack(inm_list),
                                        jnp.stack(feat_list), drug_index,
                                        true_label, drug_num)
    assert jnp.allclose(scores, ref_scores, atol=1e-2, rtol=1e-2), "scores mismatch"
    assert jnp.allclose(loss, ref_loss, atol=1e-2, rtol=1e-2), "loss mismatch"

    print("KERNEL_OK")
</pallas_src>

<mosaic_0001>
module attributes {stable_mosaic.version = 11 : i64} {
  func.func @tail_kernel(%arg0: memref<1xf32, #tpu.memory_space<smem>>, %arg1: memref<2x4x8xf32, #tpu.memory_space<vmem>>, %arg2: memref<4x256xf32, #tpu.memory_space<vmem>>, %arg3: memref<8x256xf32, #tpu.memory_space<vmem>>, %arg4: memref<256x128xf32, #tpu.memory_space<vmem>>, %arg5: memref<1x128xf32, #tpu.memory_space<vmem>>, %arg6: memref<128x128xf32, #tpu.memory_space<vmem>>, %arg7: memref<1x128xf32, #tpu.memory_space<vmem>>, %arg8: memref<256x128xf32, #tpu.memory_space<vmem>>, %arg9: memref<1x128xf32, #tpu.memory_space<vmem>>, %arg10: memref<128x128xf32, #tpu.memory_space<vmem>>, %arg11: memref<1x128xf32, #tpu.memory_space<vmem>>, %arg12: memref<4x8xf32, #tpu.memory_space<vmem>>, %arg13: memref<4x8xf32, #tpu.memory_space<vmem>>, %arg14: memref<1x1xf32, #tpu.memory_space<smem>>) attributes {dimension_semantics = [], scalar_prefetch = 0 : i64, scratch_operands = 0 : i64, tpu.core_type = #tpu.core_type<tc>} {
    %c0 = arith.constant 0 : index
    %c0_0 = arith.constant 0 : index
    %c0_1 = arith.constant 0 : index
    %0 = vector.load %arg1[%c0, %c0_0, %c0_1] : memref<2x4x8xf32, #tpu.memory_space<vmem>>, vector<1x4x8xf32>
    %1 = vector.shape_cast %0 : vector<1x4x8xf32> to vector<4x8xf32>
    %c1 = arith.constant 1 : index
    %c0_2 = arith.constant 0 : index
    %c0_3 = arith.constant 0 : index
    %2 = vector.load %arg1[%c1, %c0_2, %c0_3] : memref<2x4x8xf32, #tpu.memory_space<vmem>>, vector<1x4x8xf32>
    %3 = vector.shape_cast %2 : vector<1x4x8xf32> to vector<4x8xf32>
    %4 = arith.addf %1, %3 : vector<4x8xf32>
    %cst = arith.constant 5.000000e-01 : f32
    %5 = vector.broadcast %cst : f32 to vector<4x8xf32>
    %6 = arith.mulf %4, %5 : vector<4x8xf32>
    %c0_4 = arith.constant 0 : index
    %c0_5 = arith.constant 0 : index
    %7 = vector.load %arg2[%c0_4, %c0_5] : memref<4x256xf32, #tpu.memory_space<vmem>>, vector<4x256xf32>
    %c0_6 = arith.constant 0 : index
    %c0_7 = arith.constant 0 : index
    %8 = vector.load %arg4[%c0_6, %c0_7] : memref<256x128xf32, #tpu.memory_space<vmem>>, vector<256x128xf32>
    %9 = arith.truncf %7 : vector<4x256xf32> to vector<4x256xbf16>
    %10 = arith.truncf %8 : vector<256x128xf32> to vector<256x128xbf16>
    %cst_8 = arith.constant dense<0.000000e+00> : vector<4x128xf32>
    %11 = tpu.matmul %9, %10, %cst_8 {dimension_numbers = #tpu.dot_dimension_numbers<[1], [0], [0], [1], [0, 0, 1, 1], [], []>} : vector<4x256xbf16>, vector<256x128xbf16>, vector<4x128xf32> -> vector<4x128xf32>
    %c0_9 = arith.constant 0 : index
    %c0_10 = arith.constant 0 : index
    %12 = vector.load %arg5[%c0_9, %c0_10] : memref<1x128xf32, #tpu.memory_space<vmem>>, vector<1x128xf32>
    %13 = vector.broadcast %12 : vector<1x128xf32> to vector<4x128xf32>
    %14 = arith.addf %11, %13 : vector<4x128xf32>
    %cst_11 = arith.constant 0.000000e+00 : f32
    %15 = vector.broadcast %cst_11 : f32 to vector<4x128xf32>
    %16 = arith.maximumf %14, %15 : vector<4x128xf32>
    %c0_12 = arith.constant 0 : index
    %c0_13 = arith.constant 0 : index
    %17 = vector.load %arg6[%c0_12, %c0_13] : memref<128x128xf32, #tpu.memory_space<vmem>>, vector<128x128xf32>
    %18 = arith.truncf %16 : vector<4x128xf32> to vector<4x128xbf16>
    %19 = arith.truncf %17 : vector<128x128xf32> to vector<128x128xbf16>
    %cst_14 = arith.constant dense<0.000000e+00> : vector<4x128xf32>
    %20 = tpu.matmul %18, %19, %cst_14 {dimension_numbers = #tpu.dot_dimension_numbers<[1], [0], [0], [1], [0, 0, 1, 1], [], []>} : vector<4x128xbf16>, vector<128x128xbf16>, vector<4x128xf32> -> vector<4x128xf32>
    %c0_15 = arith.constant 0 : index
    %c0_16 = arith.constant 0 : index
    %21 = vector.load %arg7[%c0_15, %c0_16] : memref<1x128xf32, #tpu.memory_space<vmem>>, vector<1x128xf32>
    %22 = vector.broadcast %21 : vector<1x128xf32> to vector<4x128xf32>
    %23 = arith.addf %20, %22 : vector<4x128xf32>
    %c0_17 = arith.constant 0 : index
    %c0_18 = arith.constant 0 : index
    %24 = vector.load %arg3[%c0_17, %c0_18] : memref<8x256xf32, #tpu.memory_space<vmem>>, vector<8x256xf32>
    %c0_19 = arith.constant 0 : index
    %c0_20 = arith.constant 0 : index
    %25 = vector.load %arg8[%c0_19, %c0_20] : memref<256x128xf32, #tpu.memory_space<vmem>>, vector<256x128xf32>
    %26 = arith.truncf %24 : vector<8x256xf32> to vector<8x256xbf16>
    %27 = arith.truncf %25 : vector<256x128xf32> to vector<256x128xbf16>
    %cst_21 = arith.constant dense<0.000000e+00> : vector<8x128xf32>
    %28 = tpu.matmul %26, %27, %cst_21 {dimension_numbers = #tpu.dot_dimension_numbers<[1], [0], [0], [1], [0, 0, 1, 1], [], []>} : vector<8x256xbf16>, vector<256x128xbf16>, vector<8x128xf32> -> vector<8x128xf32>
    %c0_22 = arith.constant 0 : index
    %c0_23 = arith.constant 0 : index
    %29 = vector.load %arg9[%c0_22, %c0_23] : memref<1x128xf32, #tpu.memory_space<vmem>>, vector<1x128xf32>
    %30 = vector.broadcast %29 : vector<1x128xf32> to vector<8x128xf32>
    %31 = arith.addf %28, %30 : vector<8x128xf32>
    %cst_24 = arith.constant 0.000000e+00 : f32
    %32 = vector.broadcast %cst_24 : f32 to vector<8x128xf32>
    %33 = arith.maximumf %31, %32 : vector<8x128xf32>
    %c0_25 = arith.constant 0 : index
    %c0_26 = arith.constant 0 : index
    %34 = vector.load %arg10[%c0_25, %c0_26] : memref<128x128xf32, #tpu.memory_space<vmem>>, vector<128x128xf32>
    %35 = arith.truncf %33 : vector<8x128xf32> to vector<8x128xbf16>
    %36 = arith.truncf %34 : vector<128x128xf32> to vector<128x128xbf16>
    %cst_27 = arith.constant dense<0.000000e+00> : vector<8x128xf32>
    %37 = tpu.matmul %35, %36, %cst_27 {dimension_numbers = #tpu.dot_dimension_numbers<[1], [0], [0], [1], [0, 0, 1, 1], [], []>} : vector<8x128xbf16>, vector<128x128xbf16>, vector<8x128xf32> -> vector<8x128xf32>
    %c0_28 = arith.constant 0 : index
    %c0_29 = arith.constant 0 : index
    %38 = vector.load %arg11[%c0_28, %c0_29] : memref<1x128xf32, #tpu.memory_space<vmem>>, vector<1x128xf32>
    %39 = vector.broadcast %38 : vector<1x128xf32> to vector<8x128xf32>
    %40 = arith.addf %37, %39 : vector<8x128xf32>
    %41 = arith.truncf %23 : vector<4x128xf32> to vector<4x128xbf16>
    %42 = arith.truncf %40 : vector<8x128xf32> to vector<8x128xbf16>
    %cst_30 = arith.constant dense<0.000000e+00> : vector<4x8xf32>
    %43 = tpu.matmul %41, %42, %cst_30 {dimension_numbers = #tpu.dot_dimension_numbers<[1], [1], [0], [0], [0, 0, 1, 0], [], []>} : vector<4x128xbf16>, vector<8x128xbf16>, vector<4x8xf32> -> vector<4x8xf32>
    %44 = arith.addf %6, %43 : vector<4x8xf32>
    %cst_31 = arith.constant 5.000000e-01 : f32
    %45 = vector.broadcast %cst_31 : f32 to vector<4x8xf32>
    %46 = arith.mulf %44, %45 : vector<4x8xf32>
    %c0_32 = arith.constant 0 : index
    %c0_33 = arith.constant 0 : index
    %47 = vector.load %arg13[%c0_32, %c0_33] : memref<4x8xf32, #tpu.memory_space<vmem>>, vector<4x8xf32>
    tpu.vector_store %arg13[%c0_32, %c0_33], %46 {strides = array<i32>} : memref<4x8xf32, #tpu.memory_space<vmem>>, vector<4x8xf32>,
    %c0_34 = arith.constant 0 : index
    %c0_35 = arith.constant 0 : index
    %48 = vector.load %arg12[%c0_34, %c0_35] : memref<4x8xf32, #tpu.memory_space<vmem>>, vector<4x8xf32>
    %cst_36 = arith.constant 0.000000e+00 : f32
    %49 = vector.broadcast %cst_36 : f32 to vector<4x8xf32>
    %50 = arith.cmpf one, %48, %49 : vector<4x8xf32>
    %cst_37 = arith.constant 1.000000e+00 : f32
    %cst_38 = arith.constant 0.000000e+00 : f32
    %51 = vector.broadcast %cst_37 : f32 to vector<4x8xf32>
    %52 = vector.broadcast %cst_38 : f32 to vector<4x8xf32>
    %53 = arith.select %50, %51, %52 : vector<4x8xi1>, vector<4x8xf32>
    %c0_39 = arith.constant 0 : index
    %54 = memref.load %arg0[%c0_39] : memref<1xf32, #tpu.memory_space<smem>>
    %cst_40 = arith.constant 0.000000e+00 : f32
    %55 = vector.broadcast %cst_40 : f32 to vector<4x8xf32>
    %56 = arith.subf %55, %46 : vector<4x8xf32>
    %cst_41 = arith.constant 0.000000e+00 : f32
    %57 = vector.broadcast %cst_41 : f32 to vector<4x8xf32>
    %58 = arith.maximumf %56, %57 : vector<4x8xf32>
    %59 = math.absf %46 : vector<4x8xf32>
    %cst_42 = arith.constant 0.000000e+00 : f32
    %60 = vector.broadcast %cst_42 : f32 to vector<4x8xf32>
    %61 = arith.subf %60, %59 : vector<4x8xf32>
    %62 = math.exp %61 : vector<4x8xf32>
    %cst_43 = arith.constant 1.000000e+00 : f32
    %63 = vector.broadcast %cst_43 : f32 to vector<4x8xf32>
    %64 = arith.addf %63, %62 : vector<4x8xf32>
    %65 = math.log %64 : vector<4x8xf32>
    %66 = arith.addf %58, %65 : vector<4x8xf32>
    %cst_44 = arith.constant 1.000000e+00 : f32
    %67 = vector.broadcast %cst_44 : f32 to vector<4x8xf32>
    %68 = arith.subf %67, %53 : vector<4x8xf32>
    %69 = arith.mulf %68, %46 : vector<4x8xf32>
    %cst_45 = arith.constant 1.000000e+00 : f32
    %70 = arith.subf %54, %cst_45 : f32
    %71 = vector.broadcast %70 : f32 to vector<4x8xf32>
    %72 = arith.mulf %71, %53 : vector<4x8xf32>
    %cst_46 = arith.constant 1.000000e+00 : f32
    %73 = vector.broadcast %cst_46 : f32 to vector<4x8xf32>
    %74 = arith.addf %73, %72 : vector<4x8xf32>
    %75 = arith.mulf %74, %66 : vector<4x8xf32>
    %76 = arith.addf %69, %75 : vector<4x8xf32>
    %77 = vector.shape_cast %76 : vector<4x8xf32> to vector<1x4x8xf32>
    %cst_47 = arith.constant dense<0.000000e+00> : vector<1xf32>
    %78 = vector.multi_reduction <add>, %77, %cst_47 [1, 2] : vector<1x4x8xf32> to vector<1xf32>
    %79 = vector.shape_cast %78 : vector<1xf32> to vector<1x1x1xf32>
    %80 = vector.extract %79[0, 0, 0] : f32 from vector<1x1x1xf32>
    %cst_48 = arith.constant 3.125000e-02 : f32
    %81 = arith.mulf %80, %cst_48 : f32
    %c0_49 = arith.constant 0 : index
    %c0_50 = arith.constant 0 : index
    %82 = memref.load %arg14[%c0_49, %c0_50] : memref<1x1xf32, #tpu.memory_space<smem>>
    memref.store %81, %arg14[%c0_49, %c0_50] : memref<1x1xf32, #tpu.memory_space<smem>>
    return
  }
}

module attributes {stable_mosaic.version = 11 : i64} {
  func.func @hetenet_block_kernel(%arg0: i32, %arg1: memref<2x3xf32, #tpu.memory_space<smem>>, %arg2: memref<1x16x16xf32, #tpu.memory_space<vmem>>, %arg3: memref<1x16x16xf32, #tpu.memory_space<vmem>>, %arg4: memref<4x16xf32, #tpu.memory_space<vmem>>, %arg5: memref<1x16x128xf32, #tpu.memory_space<vmem>>, %arg6: memref<1x1x128xf32, #tpu.memory_space<vmem>>, %arg7: memref<1x1x128xf32, #tpu.memory_space<vmem>>, %arg8: memref<1x1x128xf32, #tpu.memory_space<vmem>>, %arg9: memref<1x128x128xf32, #tpu.memory_space<vmem>>, %arg10: memref<1x1x128xf32, #tpu.memory_space<vmem>>, %arg11: memref<1x1x128xf32, #tpu.memory_space<vmem>>, %arg12: memref<1x1x128xf32, #tpu.memory_space<vmem>>, %arg13: memref<1x128x128xf32, #tpu.memory_space<vmem>>, %arg14: memref<1x1x128xf32, #tpu.memory_space<vmem>>, %arg15: memref<1x1x128xf32, #tpu.memory_space<vmem>>, %arg16: memref<1x1x128xf32, #tpu.memory_space<vmem>>, %arg17: memref<4x128xf32, #tpu.memory_space<vmem>>, %arg18: memref<8x128xf32, #tpu.memory_space<vmem>>, %arg19: memref<1x4x8xf32, #tpu.memory_space<vmem>>) attributes {dimension_semantics = [#tpu.dimension_semantics<parallel>], iteration_bounds = array<i64: 2>, scalar_prefetch = 0 : i64, scratch_operands = 0 : i64, tpu.core_type = #tpu.core_type<tc>, window_params = [{transform_indices = @transform_0, window_bounds = array<i64: 2, 3>}, {transform_indices = @transform_1, window_bounds = array<i64: 1, 16, 16>}, {transform_indices = @transform_2, window_bounds = array<i64: 1, 16, 16>}, {pipeline_mode = #tpu.pipeline_mode<synchronous>, transform_indices = @transform_3, window_bounds = array<i64: 4, 16>}, {transform_indices = @transform_4, window_bounds = array<i64: 1, 16, 128>}, {transform_indices = @transform_5, window_bounds = array<i64: 1, 1, 128>}, {transform_indices = @transform_6, window_bounds = array<i64: 1, 1, 128>}, {transform_indices = @transform_7, window_bounds = array<i64: 1, 1, 128>}, {transform_indices = @transform_8, window_bounds = array<i64: 1, 128, 128>}, {transform_indices = @transform_9, window_bounds = array<i64: 1, 1, 128>}, {transform_indices = @transform_10, window_bounds = array<i64: 1, 1, 128>}, {transform_indices = @transform_11, window_bounds = array<i64: 1, 1, 128>}, {transform_indices = @transform_12, window_bounds = array<i64: 1, 128, 128>}, {transform_indices = @transform_13, window_bounds = array<i64: 1, 1, 128>}, {transform_indices = @transform_14, window_bounds = array<i64: 1, 1, 128>}, {transform_indices = @transform_15, window_bounds = array<i64: 1, 1, 128>}, {transform_indices = @transform_16, window_bounds = array<i64: 4, 128>}, {transform_indices = @transform_17, window_bounds = array<i64: 8, 128>}, {transform_indices = @transform_18, window_bounds = array<i64: 1, 4, 8>}]} {
    %c0 = arith.constant 0 : index
    %c0_0 = arith.constant 0 : index
    %c0_1 = arith.constant 0 : index
    %0 = vector.load %arg2[%c0, %c0_0, %c0_1] : memref<1x16x16xf32, #tpu.memory_space<vmem>>, vector<1x16x16xf32>
    %1 = vector.shape_cast %0 : vector<1x16x16xf32> to vector<16x16xf32>
    %2 = arith.truncf %1 : vector<16x16xf32> to vector<16x16xbf16>
    %c0_2 = arith.constant 0 : index
    %c0_3 = arith.constant 0 : index
    %c0_4 = arith.constant 0 : index
    %3 = vector.load %arg3[%c0_2, %c0_3, %c0_4] : memref<1x16x16xf32, #tpu.memory_space<vmem>>, vector<1x16x16xf32>
    %4 = vector.shape_cast %3 : vector<1x16x16xf32> to vector<16x16xf32>
    %c0_5 = arith.constant 0 : index
    %c0_6 = arith.constant 0 : index
    %c0_7 = arith.constant 0 : index
    %5 = vector.load %arg5[%c0_5, %c0_6, %c0_7] : memref<1x16x128xf32, #tpu.memory_space<vmem>>, vector<1x16x128xf32>
    %6 = vector.shape_cast %5 : vector<1x16x128xf32> to vector<16x128xf32>
    %7 = arith.truncf %4 : vector<16x16xf32> to vector<16x16xbf16>
    %8 = arith.truncf %6 : vector<16x128xf32> to vector<16x128xbf16>
    %cst = arith.constant dense<0.000000e+00> : vector<16x128xf32>
    %9 = tpu.matmul %7, %8, %cst {dimension_numbers = #tpu.dot_dimension_numbers<[1], [0], [0], [1], [0, 0, 1, 1], [], []>} : vector<16x16xbf16>, vector<16x128xbf16>, vector<16x128xf32> -> vector<16x128xf32>
    %c0_8 = arith.constant 0 : index
    %c0_9 = arith.constant 0 : index
    %c0_10 = arith.constant 0 : index
    %10 = vector.load %arg6[%c0_8, %c0_9, %c0_10] : memref<1x1x128xf32, #tpu.memory_space<vmem>>, vector<1x1x128xf32>
    %11 = vector.shape_cast %10 : vector<1x1x128xf32> to vector<1x128xf32>
    %12 = vector.broadcast %11 : vector<1x128xf32> to vector<16x128xf32>
    %13 = arith.addf %9, %12 : vector<16x128xf32>
    %cst_11 = arith.constant dense<0.000000e+00> : vector<16xf32>
    %14 = vector.multi_reduction <add>, %13, %cst_11 [1] : vector<16x128xf32> to vector<16xf32>
    %15 = vector.shape_cast %14 : vector<16xf32> to vector<16x1xf32>
    %cst_12 = arith.constant 1.280000e+02 : f32
    %16 = vector.broadcast %cst_12 : f32 to vector<16x1xf32>
    %17 = arith.divf %15, %16 : vector<16x1xf32>
    %18 = vector.broadcast %17 : vector<16x1xf32> to vector<16x128xf32>
    %19 = arith.subf %13, %18 : vector<16x128xf32>
    %20 = vector.broadcast %17 : vector<16x1xf32> to vector<16x128xf32>
    %21 = arith.subf %13, %20 : vector<16x128xf32>
    %22 = arith.mulf %19, %21 : vector<16x128xf32>
    %cst_13 = arith.constant dense<0.000000e+00> : vector<16xf32>
    %23 = vector.multi_reduction <add>, %22, %cst_13 [1] : vector<16x128xf32> to vector<16xf32>
    %24 = vector.shape_cast %23 : vector<16xf32> to vector<16x1xf32>
    %cst_14 = arith.constant 1.280000e+02 : f32
    %25 = vector.broadcast %cst_14 : f32 to vector<16x1xf32>
    %26 = arith.divf %24, %25 : vector<16x1xf32>
    %27 = vector.broadcast %17 : vector<16x1xf32> to vector<16x128xf32>
    %28 = arith.subf %13, %27 : vector<16x128xf32>
    %cst_15 = arith.constant 9.99999974E-6 : f32
    %29 = vector.broadcast %cst_15 : f32 to vector<16x1xf32>
    %30 = arith.addf %26, %29 : vector<16x1xf32>
    %31 = math.rsqrt %30 : vector<16x1xf32>
    %32 = vector.broadcast %31 : vector<16x1xf32> to vector<16x128xf32>
    %33 = arith.mulf %28, %32 : vector<16x128xf32>
    %c0_16 = arith.constant 0 : index
    %c0_17 = arith.constant 0 : index
    %c0_18 = arith.constant 0 : index
    %34 = vector.load %arg7[%c0_16, %c0_17, %c0_18] : memref<1x1x128xf32, #tpu.memory_space<vmem>>, vector<1x1x128xf32>
    %35 = vector.shape_cast %34 : vector<1x1x128xf32> to vector<1x128xf32>
    %36 = vector.broadcast %35 : vector<1x128xf32> to vector<16x128xf32>
    %37 = arith.mulf %33, %36 : vector<16x128xf32>
    %c0_19 = arith.constant 0 : index
    %c0_20 = arith.constant 0 : index
    %c0_21 = arith.constant 0 : index
    %38 = vector.load %arg8[%c0_19, %c0_20, %c0_21] : memref<1x1x128xf32, #tpu.memory_space<vmem>>, vector<1x1x128xf32>
    %39 = vector.shape_cast %38 : vector<1x1x128xf32> to vector<1x128xf32>
    %40 = vector.broadcast %39 : vector<1x128xf32> to vector<16x128xf32>
    %41 = arith.addf %37, %40 : vector<16x128xf32>
    %cst_22 = arith.constant 0.000000e+00 : f32
    %42 = vector.broadcast %cst_22 : f32 to vector<16x128xf32>
    %43 = arith.maximumf %41, %42 : vector<16x128xf32>
    %44 = arith.truncf %43 : vector<16x128xf32> to vector<16x128xbf16>
    %cst_23 = arith.constant dense<0.000000e+00> : vector<16x128xf32>
    %45 = tpu.matmul %2, %44, %cst_23 {dimension_numbers = #tpu.dot_dimension_numbers<[1], [0], [0], [1], [0, 0, 1, 1], [], []>} : vector<16x16xbf16>, vector<16x128xbf16>, vector<16x128xf32> -> vector<16x128xf32>
    %c0_24 = arith.constant 0 : index
    %c0_25 = arith.constant 0 : index
    %c0_26 = arith.constant 0 : index
    %46 = vector.load %arg9[%c0_24, %c0_25, %c0_26] : memref<1x128x128xf32, #tpu.memory_space<vmem>>, vector<1x128x128xf32>
    %47 = vector.shape_cast %46 : vector<1x128x128xf32> to vector<128x128xf32>
    %48 = arith.truncf %45 : vector<16x128xf32> to vector<16x128xbf16>
    %49 = arith.truncf %47 : vector<128x128xf32> to vector<128x128xbf16>
    %cst_27 = arith.constant dense<0.000000e+00> : vector<16x128xf32>
    %50 = tpu.matmul %48, %49, %cst_27 {dimension_numbers = #tpu.dot_dimension_numbers<[1], [0], [0], [1], [0, 0, 1, 1], [], []>} : vector<16x128xbf16>, vector<128x128xbf16>, vector<16x128xf32> -> vector<16x128xf32>
    %c0_28 = arith.constant 0 : index
    %c0_29 = arith.constant 0 : index
    %c0_30 = arith.constant 0 : index
    %51 = vector.load %arg10[%c0_28, %c0_29, %c0_30] : memref<1x1x128xf32, #tpu.memory_space<vmem>>, vector<1x1x128xf32>
    %52 = vector.shape_cast %51 : vector<1x1x128xf32> to vector<1x128xf32>
    %53 = vector.broadcast %52 : vector<1x128xf32> to vector<16x128xf32>
    %54 = arith.addf %50, %53 : vector<16x128xf32>
    %cst_31 = arith.constant dense<0.000000e+00> : vector<16xf32>
    %55 = vector.multi_reduction <add>, %54, %cst_31 [1] : vector<16x128xf32> to vector<16xf32>
    %56 = vector.shape_cast %55 : vector<16xf32> to vector<16x1xf32>
    %cst_32 = arith.constant 1.280000e+02 : f32
    %57 = vector.broadcast %cst_32 : f32 to vector<16x1xf32>
    %58 = arith.divf %56, %57 : vector<16x1xf32>
    %59 = vector.broadcast %58 : vector<16x1xf32> to vector<16x128xf32>
    %60 = arith.subf %54, %59 : vector<16x128xf32>
    %61 = vector.broadcast %58 : vector<16x1xf32> to vector<16x128xf32>
    %62 = arith.subf %54, %61 : vector<16x128xf32>
    %63 = arith.mulf %60, %62 : vector<16x128xf32>
    %cst_33 = arith.constant dense<0.000000e+00> : vector<16xf32>
    %64 = vector.multi_reduction <add>, %63, %cst_33 [1] : vector<16x128xf32> to vector<16xf32>
    %65 = vector.shape_cast %64 : vector<16xf32> to vector<16x1xf32>
    %cst_34 = arith.constant 1.280000e+02 : f32
    %66 = vector.broadcast %cst_34 : f32 to vector<16x1xf32>
    %67 = arith.divf %65, %66 : vector<16x1xf32>
    %68 = vector.broadcast %58 : vector<16x1xf32> to vector<16x128xf32>
    %69 = arith.subf %54, %68 : vector<16x128xf32>
    %cst_35 = arith.constant 9.99999974E-6 : f32
    %70 = vector.broadcast %cst_35 : f32 to vector<16x1xf32>
    %71 = arith.addf %67, %70 : vector<16x1xf32>
    %72 = math.rsqrt %71 : vector<16x1xf32>
    %73 = vector.broadcast %72 : vector<16x1xf32> to vector<16x128xf32>
    %74 = arith.mulf %69, %73 : vector<16x128xf32>
    %c0_36 = arith.constant 0 : index
    %c0_37 = arith.constant 0 : index
    %c0_38 = arith.constant 0 : index
    %75 = vector.load %arg11[%c0_36, %c0_37, %c0_38] : memref<1x1x128xf32, #tpu.memory_space<vmem>>, vector<1x1x128xf32>
    %76 = vector.shape_cast %75 : vector<1x1x128xf32> to vector<1x128xf32>
    %77 = vector.broadcast %76 : vector<1x128xf32> to vector<16x128xf32>
    %78 = arith.mulf %74, %77 : vector<16x128xf32>
    %c0_39 = arith.constant 0 : index
    %c0_40 = arith.constant 0 : index
    %c0_41 = arith.constant 0 : index
    %79 = vector.load %arg12[%c0_39, %c0_40, %c0_41] : memref<1x1x128xf32, #tpu.memory_space<vmem>>, vector<1x1x128xf32>
    %80 = vector.shape_cast %79 : vector<1x1x128xf32> to vector<1x128xf32>
    %81 = vector.broadcast %80 : vector<1x128xf32> to vector<16x128xf32>
    %82 = arith.addf %78, %81 : vector<16x128xf32>
    %cst_42 = arith.constant 0.000000e+00 : f32
    %83 = vector.broadcast %cst_42 : f32 to vector<16x128xf32>
    %84 = arith.maximumf %82, %83 : vector<16x128xf32>
    %85 = arith.truncf %84 : vector<16x128xf32> to vector<16x128xbf16>
    %cst_43 = arith.constant dense<0.000000e+00> : vector<16x128xf32>
    %86 = tpu.matmul %2, %85, %cst_43 {dimension_numbers = #tpu.dot_dimension_numbers<[1], [0], [0], [1], [0, 0, 1, 1], [], []>} : vector<16x16xbf16>, vector<16x128xbf16>, vector<16x128xf32> -> vector<16x128xf32>
    %c0_44 = arith.constant 0 : index
    %c0_45 = arith.constant 0 : index
    %c0_46 = arith.constant 0 : index
    %87 = vector.load %arg13[%c0_44, %c0_45, %c0_46] : memref<1x128x128xf32, #tpu.memory_space<vmem>>, vector<1x128x128xf32>
    %88 = vector.shape_cast %87 : vector<1x128x128xf32> to vector<128x128xf32>
    %89 = arith.truncf %86 : vector<16x128xf32> to vector<16x128xbf16>
    %90 = arith.truncf %88 : vector<128x128xf32> to vector<128x128xbf16>
    %cst_47 = arith.constant dense<0.000000e+00> : vector<16x128xf32>
    %91 = tpu.matmul %89, %90, %cst_47 {dimension_numbers = #tpu.dot_dimension_numbers<[1], [0], [0], [1], [0, 0, 1, 1], [], []>} : vector<16x128xbf16>, vector<128x128xbf16>, vector<16x128xf32> -> vector<16x128xf32>
    %c0_48 = arith.constant 0 : index
    %c0_49 = arith.constant 0 : index
    %c0_50 = arith.constant 0 : index
    %92 = vector.load %arg14[%c0_48, %c0_49, %c0_50] : memref<1x1x128xf32, #tpu.memory_space<vmem>>, vector<1x1x128xf32>
    %93 = vector.shape_cast %92 : vector<1x1x128xf32> to vector<1x128xf32>
    %94 = vector.broadcast %93 : vector<1x128xf32> to vector<16x128xf32>
    %95 = arith.addf %91, %94 : vector<16x128xf32>
    %cst_51 = arith.constant dense<0.000000e+00> : vector<16xf32>
    %96 = vector.multi_reduction <add>, %95, %cst_51 [1] : vector<16x128xf32> to vector<16xf32>
    %97 = vector.shape_cast %96 : vector<16xf32> to vector<16x1xf32>
    %cst_52 = arith.constant 1.280000e+02 : f32
    %98 = vector.broadcast %cst_52 : f32 to vector<16x1xf32>
    %99 = arith.divf %97, %98 : vector<16x1xf32>
    %100 = vector.broadcast %99 : vector<16x1xf32> to vector<16x128xf32>
    %101 = arith.subf %95, %100 : vector<16x128xf32>
    %102 = vector.broadcast %99 : vector<16x1xf32> to vector<16x128xf32>
    %103 = arith.subf %95, %102 : vector<16x128xf32>
    %104 = arith.mulf %101, %103 : vector<16x128xf32>
    %cst_53 = arith.constant dense<0.000000e+00> : vector<16xf32>
    %105 = vector.multi_reduction <add>, %104, %cst_53 [1] : vector<16x128xf32> to vector<16xf32>
    %106 = vector.shape_cast %105 : vector<16xf32> to vector<16x1xf32>
    %cst_54 = arith.constant 1.280000e+02 : f32
    %107 = vector.broadcast %cst_54 : f32 to vector<16x1xf32>
    %108 = arith.divf %106, %107 : vector<16x1xf32>
    %109 = vector.broadcast %99 : vector<16x1xf32> to vector<16x128xf32>
    %110 = arith.subf %95, %109 : vector<16x128xf32>
    %cst_55 = arith.constant 9.99999974E-6 : f32
    %111 = vector.broadcast %cst_55 : f32 to vector<16x1xf32>
    %112 = arith.addf %108, %111 : vector<16x1xf32>
    %113 = math.rsqrt %112 : vector<16x1xf32>
    %114 = vector.broadcast %113 : vector<16x1xf32> to vector<16x128xf32>
    %115 = arith.mulf %110, %114 : vector<16x128xf32>
    %c0_56 = arith.constant 0 : index
    %c0_57 = arith.constant 0 : index
    %c0_58 = arith.constant 0 : index
    %116 = vector.load %arg15[%c0_56, %c0_57, %c0_58] : memref<1x1x128xf32, #tpu.memory_space<vmem>>, vector<1x1x128xf32>
    %117 = vector.shape_cast %116 : vector<1x1x128xf32> to vector<1x128xf32>
    %118 = vector.broadcast %117 : vector<1x128xf32> to vector<16x128xf32>
    %119 = arith.mulf %115, %118 : vector<16x128xf32>
    %c0_59 = arith.constant 0 : index
    %c0_60 = arith.constant 0 : index
    %c0_61 = arith.constant 0 : index
    %120 = vector.load %arg16[%c0_59, %c0_60, %c0_61] : memref<1x1x128xf32, #tpu.memory_space<vmem>>, vector<1x1x128xf32>
    %121 = vector.shape_cast %120 : vector<1x1x128xf32> to vector<1x128xf32>
    %122 = vector.broadcast %121 : vector<1x128xf32> to vector<16x128xf32>
    %123 = arith.addf %119, %122 : vector<16x128xf32>
    %cst_62 = arith.constant 0.000000e+00 : f32
    %124 = vector.broadcast %cst_62 : f32 to vector<16x128xf32>
    %125 = arith.maximumf %123, %124 : vector<16x128xf32>
    %126 = arith.truncf %125 : vector<16x128xf32> to vector<16x128xbf16>
    %cst_63 = arith.constant dense<0.000000e+00> : vector<16x128xf32>
    %127 = tpu.matmul %2, %126, %cst_63 {dimension_numbers = #tpu.dot_dimension_numbers<[1], [0], [0], [1], [0, 0, 1, 1], [], []>} : vector<16x16xbf16>, vector<16x128xbf16>, vector<16x128xf32> -> vector<16x128xf32>
    %128 = arith.index_cast %arg0 : i32 to index
    %c0_64 = arith.constant 0 : index
    %129 = memref.load %arg1[%128, %c0_64] : memref<2x3xf32, #tpu.memory_space<smem>>
    %130 = vector.broadcast %129 : f32 to vector<16x128xf32>
    %131 = arith.mulf %130, %45 : vector<16x128xf32>
    %132 = arith.index_cast %arg0 : i32 to index
    %c1 = arith.constant 1 : index
    %133 = memref.load %arg1[%132, %c1] : memref<2x3xf32, #tpu.memory_space<smem>>
    %134 = vector.broadcast %133 : f32 to vector<16x128xf32>
    %135 = arith.mulf %134, %86 : vector<16x128xf32>
    %136 = arith.addf %131, %135 : vector<16x128xf32>
    %137 = arith.index_cast %arg0 : i32 to index
    %c2 = arith.constant 2 : index
    %138 = memref.load %arg1[%137, %c2] : memref<2x3xf32, #tpu.memory_space<smem>>
    %139 = vector.broadcast %138 : f32 to vector<16x128xf32>
    %140 = arith.mulf %139, %127 : vector<16x128xf32>
    %141 = arith.addf %136, %140 : vector<16x128xf32>
    %c0_65 = arith.constant 0 : index
    %c0_66 = arith.constant 0 : index
    %142 = vector.load %arg4[%c0_65, %c0_66] : memref<4x16xf32, #tpu.memory_space<vmem>>, vector<4x16xf32>
    %cst_67 = arith.constant dense<0.000000e+00> : vector<4x128xf32>
    %143 = tpu.matmul %142, %141, %cst_67 {dimension_numbers = #tpu.dot_dimension_numbers<[1], [0], [0], [1], [0, 0, 1, 1], [], []>} : vector<4x16xf32>, vector<16x128xf32>, vector<4x128xf32> -> vector<4x128xf32>
    %144 = vector.extract_strided_slice %141 {offsets = [8, 0], sizes = [8, 128], strides = [1, 1]} : vector<16x128xf32> to vector<8x128xf32>
    %c0_68 = arith.constant 0 : index
    %c0_69 = arith.constant 0 : index
    %145 = vector.load %arg17[%c0_68, %c0_69] : memref<4x128xf32, #tpu.memory_space<vmem>>, vector<4x128xf32>
    tpu.vector_store %arg17[%c0_68, %c0_69], %143 {strides = array<i32>} : memref<4x128xf32, #tpu.memory_space<vmem>>, vector<4x128xf32>,
    %c0_70 = arith.constant 0 : index
    %c0_71 = arith.constant 0 : index
    %146 = vector.load %arg18[%c0_70, %c0_71] : memref<8x128xf32, #tpu.memory_space<vmem>>, vector<8x128xf32>
    tpu.vector_store %arg18[%c0_70, %c0_71], %144 {strides = array<i32>} : memref<8x128xf32, #tpu.memory_space<vmem>>, vector<8x128xf32>,
    %147 = arith.truncf %143 : vector<4x128xf32> to vector<4x128xbf16>
    %148 = arith.truncf %144 : vector<8x128xf32> to vector<8x128xbf16>
    %cst_72 = arith.constant dense<0.000000e+00> : vector<4x8xf32>
    %149 = tpu.matmul %147, %148, %cst_72 {dimension_numbers = #tpu.dot_dimension_numbers<[1], [1], [0], [0], [0, 0, 1, 0], [], []>} : vector<4x128xbf16>, vector<8x128xbf16>, vector<4x8xf32> -> vector<4x8xf32>
    %c0_73 = arith.constant 0 : index
    %c0_74 = arith.constant 0 : index
    %c0_75 = arith.constant 0 : index
    %150 = vector.load %arg19[%c0_73, %c0_74, %c0_75] : memref<1x4x8xf32, #tpu.memory_space<vmem>>, vector<1x4x8xf32>
    %151 = vector.shape_cast %150 : vector<1x4x8xf32> to vector<4x8xf32>
    %152 = vector.shape_cast %149 : vector<4x8xf32> to vector<1x4x8xf32>
    tpu.vector_store %arg19[%c0_73, %c0_74, %c0_75], %152 {strides = array<i32>} : memref<1x4x8xf32, #tpu.memory_space<vmem>>, vector<1x4x8xf32>,
    return
  }
  func.func @transform_0(%arg0: i32) -> (i32, i32) {
    %c0_i32 = arith.constant 0 : i32
    %c0_i32_0 = arith.constant 0 : i32
    %c0_i32_1 = arith.constant 0 : i32
    return %c0_i32, %c0_i32_0 : i32, i32
  }
  func.func @transform_1(%arg0: i32) -> (i32, i32, i32) {
    %c0_i32 = arith.constant 0 : i32
    %c0_i32_0 = arith.constant 0 : i32
    %c0_i32_1 = arith.constant 0 : i32
    return %arg0, %c0_i32, %c0_i32_0 : i32, i32, i32
  }
  func.func @transform_2(%arg0: i32) -> (i32, i32, i32) {
    %c0_i32 = arith.constant 0 : i32
    %c0_i32_0 = arith.constant 0 : i32
    %c0_i32_1 = arith.constant 0 : i32
    return %arg0, %c0_i32, %c0_i32_0 : i32, i32, i32
  }
  func.func @transform_3(%arg0: i32) -> (i32, i32) {
    %c0_i32 = arith.constant 0 : i32
    %c0_i32_0 = arith.constant 0 : i32
    %c0_i32_1 = arith.constant 0 : i32
    return %c0_i32, %c0_i32_0 : i32, i32
  }
  func.func @transform_4(%arg0: i32) -> (i32, i32, i32) {
    %c0_i32 = arith.constant 0 : i32
    %c0_i32_0 = arith.constant 0 : i32
    %c0_i32_1 = arith.constant 0 : i32
    return %arg0, %c0_i32, %c0_i32_0 : i32, i32, i32
  }
  func.func @transform_5(%arg0: i32) -> (i32, i32, i32) {
    %c0_i32 = arith.constant 0 : i32
    %c0_i32_0 = arith.constant 0 : i32
    %c0_i32_1 = arith.constant 0 : i32
    return %arg0, %c0_i32, %c0_i32_0 : i32, i32, i32
  }
  func.func @transform_6(%arg0: i32) -> (i32, i32, i32) {
    %c0_i32 = arith.constant 0 : i32
    %c0_i32_0 = arith.constant 0 : i32
    %c0_i32_1 = arith.constant 0 : i32
    return %arg0, %c0_i32, %c0_i32_0 : i32, i32, i32
  }
  func.func @transform_7(%arg0: i32) -> (i32, i32, i32) {
    %c0_i32 = arith.constant 0 : i32
    %c0_i32_0 = arith.constant 0 : i32
    %c0_i32_1 = arith.constant 0 : i32
    return %arg0, %c0_i32, %c0_i32_0 : i32, i32, i32
  }
  func.func @transform_8(%arg0: i32) -> (i32, i32, i32) {
    %c0_i32 = arith.constant 0 : i32
    %c0_i32_0 = arith.constant 0 : i32
    %c0_i32_1 = arith.constant 0 : i32
    return %arg0, %c0_i32, %c0_i32_0 : i32, i32, i32
  }
  func.func @transform_9(%arg0: i32) -> (i32, i32, i32) {
    %c0_i32 = arith.constant 0 : i32
    %c0_i32_0 = arith.constant 0 : i32
    %c0_i32_1 = arith.constant 0 : i32
    return %arg0, %c0_i32, %c0_i32_0 : i32, i32, i32
  }
  func.func @transform_10(%arg0: i32) -> (i32, i32, i32) {
    %c0_i32 = arith.constant 0 : i32
    %c0_i32_0 = arith.constant 0 : i32
    %c0_i32_1 = arith.constant 0 : i32
    return %arg0, %c0_i32, %c0_i32_0 : i32, i32, i32
  }
  func.func @transform_11(%arg0: i32) -> (i32, i32, i32) {
    %c0_i32 = arith.constant 0 : i32
    %c0_i32_0 = arith.constant 0 : i32
    %c0_i32_1 = arith.constant 0 : i32
    return %arg0, %c0_i32, %c0_i32_0 : i32, i32, i32
  }
  func.func @transform_12(%arg0: i32) -> (i32, i32, i32) {
    %c0_i32 = arith.constant 0 : i32
    %c0_i32_0 = arith.constant 0 : i32
    %c0_i32_1 = arith.constant 0 : i32
    return %arg0, %c0_i32, %c0_i32_0 : i32, i32, i32
  }
  func.func @transform_13(%arg0: i32) -> (i32, i32, i32) {
    %c0_i32 = arith.constant 0 : i32
    %c0_i32_0 = arith.constant 0 : i32
    %c0_i32_1 = arith.constant 0 : i32
    return %arg0, %c0_i32, %c0_i32_0 : i32, i32, i32
  }
  func.func @transform_14(%arg0: i32) -> (i32, i32, i32) {
    %c0_i32 = arith.constant 0 : i32
    %c0_i32_0 = arith.constant 0 : i32
    %c0_i32_1 = arith.constant 0 : i32
    return %arg0, %c0_i32, %c0_i32_0 : i32, i32, i32
  }
  func.func @transform_15(%arg0: i32) -> (i32, i32, i32) {
    %c0_i32 = arith.constant 0 : i32
    %c0_i32_0 = arith.constant 0 : i32
    %c0_i32_1 = arith.constant 0 : i32
    return %arg0, %c0_i32, %c0_i32_0 : i32, i32, i32
  }
  func.func @transform_16(%arg0: i32) -> (i32, i32) {
    %c0_i32 = arith.constant 0 : i32
    %c0_i32_0 = arith.constant 0 : i32
    return %c0_i32, %arg0 : i32, i32
  }
  func.func @transform_17(%arg0: i32) -> (i32, i32) {
    %c0_i32 = arith.constant 0 : i32
    %c0_i32_0 = arith.constant 0 : i32
    return %c0_i32, %arg0 : i32, i32
  }
  func.func @transform_18(%arg0: i32) -> (i32, i32, i32) {
    %c0_i32 = arith.constant 0 : i32
    %c0_i32_0 = arith.constant 0 : i32
    %c0_i32_1 = arith.constant 0 : i32
    return %arg0, %c0_i32, %c0_i32_0 : i32, i32, i32
  }
}

</mosaic_0001>

<bundles_post_ra>
// kernel: _forward_core.3
= control target key start
LH: loop header
LB: loop body
LE: loop exit
PB: predicated region body
PF: predicated region fallthrough
CT: control target
= control target key end

     0   :  { %21 = vsyncpa [#allocation4], 0  ;;  %s1176_s0 = inlined_call_operand.<no memory space> [shape: f32[1], index: 0, kind: input, shape index: {}]   ;;  %s1177_s1 = inlined_call_operand.vmem [shape: f32[2,4,8], index: 1, kind: input, shape index: {}]   ;;  %s1178_s2 = inlined_call_operand.vmem [shape: f32[4,256], index: 2, kind: input, shape index: {}]   ;;  %s1179_s3 = inlined_call_operand.vmem [shape: f32[8,256], index: 3, kind: input, shape index: {}]   ;;  %s1180_s4 = inlined_call_operand.vmem [shape: f32[256,128], index: 4, kind: input, shape index: {}]   ;;  %s1181_s5 = inlined_call_operand.vmem [shape: f32[1,128], index: 5, kind: input, shape index: {}]   ;;  %s1182_s6 = inlined_call_operand.vmem [shape: f32[128,128], index: 6, kind: input, shape index: {}]   ;;  %s1183_s7 = inlined_call_operand.hbm [shape: f32[1,128], index: 7, kind: input, shape index: {}]   ;;  %s1184_s8 = inlined_call_operand.vmem [shape: f32[256,128], index: 8, kind: input, shape index: {}]   ;;  %s1185_s9 = inlined_call_operand.hbm [shape: f32[1,128], index: 9, kind: input, shape index: {}]   ;;  %s1186_s10 = inlined_call_operand.hbm [shape: f32[128,128], index: 10, kind: input, shape index: {}]   ;;  %s1187_s11 = inlined_call_operand.hbm [shape: f32[1,128], index: 11, kind: input, shape index: {}]   ;;  %s1188_s12 = inlined_call_operand.vmem [shape: f32[4,8], index: 12, kind: input, shape index: {}]   ;;  %s1189_s13 = inlined_call_operand.vmem [shape: f32[4,8], index: 13, kind: output, shape index: {0}]   ;;  %s1190_s14 = inlined_call_operand.hbm [shape: f32[1,1], index: 14, kind: output, shape index: {1}]  }
   0x1   :  { %22 = vsyncpa [#allocation7], 0 }
   0x2   :  { %23 = vsyncpa [#allocation10], 0 }
   0x3   :  { %24 = vsyncpa [#allocation5], 0  ;;  %s778_s29 = smov [#allocation6]   ;;  %s779_s15 = smov [#allocation3]  }
   0x4   :  { %s57_s30 = sshll.u32 %s778_s29, 4  ;;  %s45_s16 = sshll.u32 %s779_s15, 4  ;;  %s58_s30 = int_to_ptr.vmem [resolvable:$true] %s57_s30  ;;  %s46_s16 = int_to_ptr.vmem [resolvable:$true] %s45_s16 }
   0x5   :  { %s690_s17 = scalar_lea.vmem %s58_s30, 16  ;;  %s694_s18 = scalar_lea.vmem %s58_s30, 32 }
   0x6   :  { %p691_p0 = scmp.ne.s32.totalorder %s58_s30, %s690_s17  ;;  %p695_p1 = scmp.lt.s32.totalorder %s58_s30, %s58_s30 }
   0x7   :  { %p696_p2 = scmp.lt.s32.totalorder %s694_s18, %s690_s17 }
   0x9   :  { %p697_p3 = por %p696_p2, %p695_p1 }
   0xb   :  { %p698_p4 = pnand %p697_p3, %p691_p0 }
   0xd   :  { %701 = shalt.err (!%p698_p4)
}
   0xe   :  { %60 = dma.hbm_to_vmem [thread:$0]  %s1185_s9, 16, %s58_s30, [#allocation7]  }
   0xf   :  { %s710_s21 = scalar_lea.vmem %s46_s16, 16  ;;  %s714_s22 = scalar_lea.vmem %s46_s16, 32 }
  0x10   :  { %p711_p5 = scmp.ne.s32.totalorder %s46_s16, %s710_s21  ;;  %p715_p6 = scmp.lt.s32.totalorder %s46_s16, %s46_s16 }
  0x11   :  { %p716_p7 = scmp.lt.s32.totalorder %s714_s22, %s710_s21 }
  0x13   :  { %p717_p8 = por %p716_p7, %p715_p6 }
  0x15   :  { %p718_p9 = pnand %p717_p8, %p711_p5 }
  0x17   :  { %721 = shalt.err (!%p718_p9)
}
  0x18   :  { %48 = dma.hbm_to_vmem [thread:$0]  %s1183_s7, 16, %s46_s16, [#allocation4]  }
  0x19   :  { %s780_s25 = smov [#allocation8]  }
  0x1a   :  { %s66_s26 = sshll.u32 %s780_s25, 4  ;;  %s67_s26 = int_to_ptr.vmem [resolvable:$true] %s66_s26 }
  0x1b   :  { %s730_s27 = scalar_lea.vmem %s67_s26, 2048  ;;  %p735_p11 = scmp.lt.s32.totalorder %s67_s26, %s67_s26 }
  0x1c   :  { %p731_p10 = scmp.ne.s32.totalorder %s67_s26, %s730_s27  ;;  %p736_p12 = scmp.lt.s32.totalorder %s730_s27, %s730_s27 }
  0x1e   :  { %p737_p13 = por %p736_p12, %p735_p11 }
  0x20   :  { %p738_p0 = pnand %p737_p13, %p731_p10 }
  0x22   :  { %741 = shalt.err (!%p738_p0)
}
  0x23   :  { %s781_s9 = smov 128   ;;  %s782_s28 = smov 8  }
  0x24   :  { %72 = dma.hbm_to_vmem [thread:$0]  %s1186_s10, 2048, %s67_s26, [#allocation7], %s781_s9, %s781_s9, %s782_s28  }
  0x25   :  { %s783_s15 = smov [#allocation9]  }
  0x26   :  { %s79_s17 = sshll.u32 %s783_s15, 4  ;;  %s80_s17 = int_to_ptr.vmem [resolvable:$true] %s79_s17 }
  0x27   :  { %s750_s7 = scalar_lea.vmem %s80_s17, 16  ;;  %s754_s16 = scalar_lea.vmem %s80_s17, 32 }
  0x28   :  { %p751_p1 = scmp.ne.s32.totalorder %s80_s17, %s750_s7  ;;  %p755_p2 = scmp.lt.s32.totalorder %s80_s17, %s80_s17 }
  0x29   :  { %p756_p3 = scmp.lt.s32.totalorder %s754_s16, %s750_s7 }
  0x2b   :  { %p757_p4 = por %p756_p3, %p755_p2 }
  0x2d   :  { %p758_p5 = pnand %p757_p4, %p751_p1 }
  0x2f   :  { %761 = shalt.err (!%p758_p5)
}
  0x30   :  { %82 = dma.hbm_to_vmem [thread:$0]  %s1187_s11, 16, %s80_s17, [#allocation10]  }
  0x31   :  { %770 = dma.done.wait [#allocation4], 16  }
  0x32   :  { %771 = vsyncadd [#allocation4], 4294967280 }
  0x33   :  { %772 = dma.done.wait [#allocation7], 2064  }
  0x34   :  { %773 = vsyncadd [#allocation7], 4294965232 }
  0x35   :  { %774 = dma.done.wait [#allocation10], 16  }
  0x36   :  { %775 = vsyncadd [#allocation10], 4294967280  ;;  %v784_v0 = vmov 0.0   ;;  %v134_v1 = vld [vmem:[%s1180_s4 + $0xf0] sm:$0xff]  ;;  %v135_v2 = vld [vmem:[%s1180_s4 + $0xf8] sm:$0xff]  ;;  %vm785_vm0 = vmmov 0  }
  0x37   :  { %620 = vmatprep.subr.bf16.mxu1 %v784_v0  ;;  %v118_v3 = vld [vmem:[%s1180_s4 + $0x70] sm:$0xff]  ;;  %v156_v4 = vpack.c.bf16 %v135_v2, %v134_v1  ;;  %v119_v5 = vld [vmem:[%s1180_s4 + $0x78] sm:$0xff]  ;;  %v132_v6 = vld [vmem:[%s1180_s4 + $0xe0] sm:$0xff]  ;;  %636 = vmatprep.mubr.msk.bf16.mxu1 %vm785_vm0, %v784_v0  ;;  %vm493_vm1 = vcmask 60416   ;;  %s555_s21 = sadd.f32 -1.0, %s1176_s0 }
  0x38   :  { %v133_v7 = vld [vmem:[%s1180_s4 + $0xe8] sm:$0xff]  ;;  %v148_v8 = vpack.c.bf16 %v119_v5, %v118_v3  ;;  %v116_v10 = vld [vmem:[%s1180_s4 + $0x60] sm:$0xff]  ;;  %v130_v12 = vld [vmem:[%s1180_s4 + $0xd0] sm:$0xff] }
  0x39   :  { %v155_v9 = vpack.c.bf16 %v133_v7, %v132_v6  ;;  %v117_v11 = vld [vmem:[%s1180_s4 + $0x68] sm:$0xff]  ;;  %556 = vmatprep.subr.bf16.mxu0 %v156_v4  ;;  %v131_v13 = vld [vmem:[%s1180_s4 + $0xd8] sm:$0xff]  ;;  %v114_v16 = vld [vmem:[%s1180_s4 + $0x50] sm:$0xff] }
  0x3a   :  { %557 = vmatpush3.bf16.msra.mxu0 %v148_v8  ;;  %v147_v14 = vpack.c.bf16 %v117_v11, %v116_v10  ;;  %v154_v15 = vpack.c.bf16 %v131_v13, %v130_v12  ;;  %v115_v17 = vld [vmem:[%s1180_s4 + $0x58] sm:$0xff]  ;;  %v128_v18 = vld [vmem:[%s1180_s4 + $0xc0] sm:$0xff]  ;;  %v129_v19 = vld [vmem:[%s1180_s4 + $0xc8] sm:$0xff] }
  0x3b   :  { %558 = vmatprep.subr.bf16.mxu0 %v155_v9  ;;  %v146_v20 = vpack.c.bf16 %v115_v17, %v114_v16  ;;  %v153_v21 = vpack.c.bf16 %v129_v19, %v128_v18  ;;  %v112_v22 = vld [vmem:[%s1180_s4 + $0x40] sm:$0xff]  ;;  %v113_v23 = vld [vmem:[%s1180_s4 + $0x48] sm:$0xff]  ;;  %v126_v24 = vld [vmem:[%s1180_s4 + $0xb0] sm:$0xff] }
  0x3c   :  { %v127_v25 = vld [vmem:[%s1180_s4 + $0xb8] sm:$0xff]  ;;  %v932_v26 = vld [vmem:[%s1178_s2] sm:$0xff]  ;;  %v145_v28 = vpack.c.bf16 %v113_v23, %v112_v22  ;;  %v110_v30 = vld [vmem:[%s1180_s4 + $0x30] sm:$0xff] }
  0x3d   :  { %v137_v27 = vcombine.high %v932_v26, %v932_v26  ;;  %v152_v29 = vpack.c.bf16 %v127_v25, %v126_v24  ;;  %v111_v31 = vld [vmem:[%s1180_s4 + $0x38] sm:$0xff]  ;;  %v124_v33 = vld [vmem:[%s1180_s4 + $0xa0] sm:$0xff]  ;;  %v125_v34 = vld [vmem:[%s1180_s4 + $0xa8] sm:$0xff]  ;;  %v139_v8 = vpack.c.bf16 %v932_v26, %v932_v26 }
  0x3e   :  { %559 = vmatpush3.bf16.msra.mxu0 %v147_v14  ;;  %v144_v35 = vpack.c.bf16 %v111_v31, %v110_v30  ;;  %v151_v36 = vpack.c.bf16 %v125_v34, %v124_v33  ;;  %v108_v37 = vld [vmem:[%s1180_s4 + $0x20] sm:$0xff]  ;;  %v109_v38 = vld [vmem:[%s1180_s4 + $0x28] sm:$0xff]  ;;  %v122_v39 = vld [vmem:[%s1180_s4 + $0x90] sm:$0xff] }
  0x3f   :  { %560 = vmatprep.subr.bf16.mxu0 %v154_v15  ;;  %v140_v32 = vpack.c.bf16 %v137_v27, %v137_v27  ;;  %v123_v40 = vld [vmem:[%s1180_s4 + $0x98] sm:$0xff]  ;;  %v143_v41 = vpack.c.bf16 %v109_v38, %v108_v37  ;;  %v106_v43 = vld [vmem:[%s1180_s4 + $0x10] sm:$0xff]  ;;  %v120_v45 = vld [vmem:[%s1180_s4 + $0x80] sm:$0xff] }
  0x40   :  { %v150_v42 = vpack.c.bf16 %v123_v40, %v122_v39  ;;  %v107_v44 = vld [vmem:[%s1180_s4 + $0x18] sm:$0xff]  ;;  %v121_v46 = vld [vmem:[%s1180_s4 + $0x88] sm:$0xff]  ;;  %v219_v47 = vld [vmem:[%s1182_s6 + $0x70] sm:$0xff] }
  0x41   :  { %196 = vmatprep.mubr.bf16.mxu0 %v140_v32  ;;  %v220_v48 = vld [vmem:[%s1182_s6 + $0x78] sm:$0xff]  ;;  %v217_v50 = vld [vmem:[%s1182_s6 + $0x60] sm:$0xff]  ;;  %v218_v51 = vld [vmem:[%s1182_s6 + $0x68] sm:$0xff]  ;;  %v142_v52 = vpack.c.bf16 %v107_v44, %v106_v43  ;;  %v149_v53 = vpack.c.bf16 %v121_v46, %v120_v45 }
  0x42   :  { %561 = vmatpush3.bf16.msra.mxu0 %v146_v20  ;;  %v229_v49 = vpack.c.bf16 %v220_v48, %v219_v47  ;;  %v104_v54 = vld [vmem:[%s1180_s4] sm:$0xff]  ;;  %v105_v55 = vld [vmem:[%s1180_s4 + $0x8] sm:$0xff]  ;;  %v309_v56 = vld [vmem:[%s1184_s8 + $0xf0] sm:$0xff]  ;;  %v228_v57 = vpack.c.bf16 %v218_v51, %v217_v50 }
  0x43   :  { %562 = vmatprep.subr.bf16.mxu0 %v153_v21  ;;  %v310_v58 = vld [vmem:[%s1184_s8 + $0xf8] sm:$0xff]  ;;  %v215_v59 = vld [vmem:[%s1182_s6 + $0x50] sm:$0xff]  ;;  %v141_v61 = vpack.c.bf16 %v105_v55, %v104_v54  ;;  %v307_v2 = vld [vmem:[%s1184_s8 + $0xe0] sm:$0xff] }
  0x44   :  { %621 = vmatpush3.bf16.msra.mxu1 %v229_v49  ;;  %v216_v60 = vld [vmem:[%s1182_s6 + $0x58] sm:$0xff]  ;;  %v293_v62 = vld [vmem:[%s1184_s8 + $0x70] sm:$0xff]  ;;  %v328_v63 = vpack.c.bf16 %v310_v58, %v309_v56  ;;  %v278_v3 = vld [vmem:[%s1179_s3 + $0x8] sm:$0xff] }
  0x45   :  { %622 = vmatprep.subr.bf16.mxu1 %v784_v0  ;;  %v294_v1 = vld [vmem:[%s1184_s8 + $0x78] sm:$0xff]  ;;  %v227_v4 = vpack.c.bf16 %v216_v60, %v215_v59  ;;  %v308_v5 = vld [vmem:[%s1184_s8 + $0xe8] sm:$0xff]  ;;  %v213_v6 = vld [vmem:[%s1182_s6 + $0x40] sm:$0xff]  ;;  %v312_v10 = vpack.c.bf16 %v278_v3, %v278_v3 }
  0x46   :  { %563 = vmatpush3.bf16.msra.mxu0 %v145_v28  ;;  %v214_v7 = vld [vmem:[%s1182_s6 + $0x48] sm:$0xff]  ;;  %v320_v9 = vpack.c.bf16 %v294_v1, %v293_v62  ;;  %v327_v11 = vpack.c.bf16 %v308_v5, %v307_v2  ;;  %v291_v12 = vld [vmem:[%s1184_s8 + $0x60] sm:$0xff]  ;;  %v305_v14 = vld [vmem:[%s1184_s8 + $0xd0] sm:$0xff] }
  0x47   :  { %564 = vmatprep.subr.bf16.mxu0 %v152_v29  ;;  %v292_v13 = vld [vmem:[%s1184_s8 + $0x68] sm:$0xff]  ;;  %v226_v15 = vpack.c.bf16 %v214_v7, %v213_v6  ;;  %v306_v16 = vld [vmem:[%s1184_s8 + $0xd8] sm:$0xff]  ;;  %v211_v17 = vld [vmem:[%s1182_s6 + $0x30] sm:$0xff] }
  0x48   :  { %623 = vmatpush3.bf16.msra.mxu1 %v228_v57  ;;  %v212_v18 = vld [vmem:[%s1182_s6 + $0x38] sm:$0xff]  ;;  %v319_v19 = vpack.c.bf16 %v292_v13, %v291_v12  ;;  %v326_v20 = vpack.c.bf16 %v306_v16, %v305_v14  ;;  %v289_v21 = vld [vmem:[%s1184_s8 + $0x50] sm:$0xff]  ;;  %v303_v24 = vld [vmem:[%s1184_s8 + $0xc0] sm:$0xff] }
  0x49   :  { %624 = vmatprep.subr.bf16.mxu1 %v784_v0  ;;  %v290_v22 = vld [vmem:[%s1184_s8 + $0x58] sm:$0xff]  ;;  %v225_v23 = vpack.c.bf16 %v212_v18, %v211_v17  ;;  %v304_v25 = vld [vmem:[%s1184_s8 + $0xc8] sm:$0xff]  ;;  %v287_v28 = vld [vmem:[%s1184_s8 + $0x40] sm:$0xff] }
  0x4a   :  { %565 = vmatpush3.bf16.msra.mxu0 %v144_v35  ;;  %v318_v26 = vpack.c.bf16 %v290_v22, %v289_v21  ;;  %v325_v27 = vpack.c.bf16 %v304_v25, %v303_v24  ;;  %v288_v29 = vld [vmem:[%s1184_s8 + $0x48] sm:$0xff]  ;;  %v301_v30 = vld [vmem:[%s1184_s8 + $0xb0] sm:$0xff]  ;;  %v302_v31 = vld [vmem:[%s1184_s8 + $0xb8] sm:$0xff] }
  0x4b   :  { %566 = vmatprep.subr.bf16.mxu0 %v151_v36  ;;  %v317_v32 = vpack.c.bf16 %v288_v29, %v287_v28  ;;  %v324_v33 = vpack.c.bf16 %v302_v31, %v301_v30  ;;  %v285_v34 = vld [vmem:[%s1184_s8 + $0x30] sm:$0xff]  ;;  %v286_v35 = vld [vmem:[%s1184_s8 + $0x38] sm:$0xff]  ;;  %v299_v36 = vld [vmem:[%s1184_s8 + $0xa0] sm:$0xff] }
  0x4c   :  { %625 = vmatpush3.bf16.msra.mxu1 %v227_v4  ;;  %v300_v37 = vld [vmem:[%s1184_s8 + $0xa8] sm:$0xff]  ;;  %v316_v38 = vpack.c.bf16 %v286_v35, %v285_v34  ;;  %v283_v40 = vld [vmem:[%s1184_s8 + $0x20] sm:$0xff]  ;;  %v298_v43 = vld [vmem:[%s1184_s8 + $0x98] sm:$0xff] }
  0x4d   :  { %626 = vmatprep.subr.bf16.mxu1 %v784_v0  ;;  %v323_v39 = vpack.c.bf16 %v300_v37, %v299_v36  ;;  %v281_v46 = vld [vmem:[%s1184_s8 + $0x10] sm:$0xff]  ;;  %v282_v47 = vld [vmem:[%s1184_s8 + $0x18] sm:$0xff]  ;;  %v295_v48 = vld [vmem:[%s1184_s8 + $0x80] sm:$0xff] }
  0x4e   :  { %567 = vmatpush3.bf16.msra.mxu0 %v143_v41  ;;  %v284_v41 = vld [vmem:[%s1184_s8 + $0x28] sm:$0xff]  ;;  %v314_v50 = vpack.c.bf16 %v282_v47, %v281_v46  ;;  %v277_v55 = vld [vmem:[%s1179_s3] sm:$0xff]  ;;  %v207_v60 = vld [vmem:[%s1182_s6 + $0x10] sm:$0xff] }
  0x4f   :  { %568 = vmatprep.subr.bf16.mxu0 %v150_v42  ;;  %v297_v42 = vld [vmem:[%s1184_s8 + $0x90] sm:$0xff]  ;;  %v315_v44 = vpack.c.bf16 %v284_v41, %v283_v40  ;;  %v296_v49 = vld [vmem:[%s1184_s8 + $0x88] sm:$0xff]  ;;  %v311_v56 = vpack.c.bf16 %v277_v55, %v277_v55  ;;  %v209_v57 = vld [vmem:[%s1182_s6 + $0x20] sm:$0xff] }
  0x50   :  { %627 = vmatpush3.bf16.msra.mxu1 %v226_v15  ;;  %v322_v45 = vpack.c.bf16 %v298_v43, %v297_v42  ;;  %v321_v51 = vpack.c.bf16 %v296_v49, %v295_v48  ;;  %v210_v58 = vld [vmem:[%s1182_s6 + $0x28] sm:$0xff]  ;;  %v551_v4 = vld [vmem:[%s1181_s5] ss:$0 sm:$0xff]  ;;  %v387_v18 = vld [vmem:[#allocation8 + $0x50] sm:$0xff] }
  0x51   :  { %628 = vmatprep.subr.bf16.mxu1 %v784_v0  ;;  %v224_v59 = vpack.c.bf16 %v210_v58, %v209_v57  ;;  %v206_v1 = vld [vmem:[%s1182_s6 + $0x8] sm:$0xff]  ;;  %v383_v24 = vld [vmem:[#allocation8 + $0x30] sm:$0xff]  ;;  %v384_v25 = vld [vmem:[#allocation8 + $0x38] sm:$0xff] }
  0x52   :  { %569 = vmatpush3.bf16.msra.mxu0 %v142_v52  ;;  %v279_v52 = vld [vmem:[%s1184_s8] sm:$0xff]  ;;  %v390_v16 = vld [vmem:[#allocation8 + $0x68] sm:$0xff]  ;;  %v379_v30 = vld [vmem:[#allocation8 + $0x10] sm:$0xff] }
  0x53   :  { %570 = vmatprep.subr.bf16.mxu0 %v149_v53  ;;  %v280_v53 = vld [vmem:[%s1184_s8 + $0x8] sm:$0xff]  ;;  %v380_v31 = vld [vmem:[#allocation8 + $0x18] sm:$0xff]  ;;  %v554_v49 = vld [vmem:[#allocation9] ss:$0 sm:$0xff] }
  0x54   :  { %629 = vmatpush3.bf16.msra.mxu1 %v225_v23  ;;  %v313_v54 = vpack.c.bf16 %v280_v53, %v279_v52  ;;  %v389_v15 = vld [vmem:[#allocation8 + $0x60] sm:$0xff]  ;;  %v386_v22 = vld [vmem:[#allocation8 + $0x48] sm:$0xff]  ;;  %v553_v36 = vld [vmem:[#allocation6] ss:$0 sm:$0xff] }
  0x55   :  { %630 = vmatprep.subr.bf16.mxu1 %v784_v0  ;;  %v400_v17 = vpack.c.bf16 %v390_v16, %v389_v15  ;;  %v385_v21 = vld [vmem:[#allocation8 + $0x40] sm:$0xff]  ;;  %v382_v28 = vld [vmem:[#allocation8 + $0x28] sm:$0xff]  ;;  %v552_v53 = vld [vmem:[#allocation3] ss:$0 sm:$0xff] }
  0x56   :  { %571 = vmatpush3.bf16.msra.mxu0 %v141_v61  ;;  %v208_v61 = vld [vmem:[%s1182_s6 + $0x18] sm:$0xff]  ;;  %v398_v23 = vpack.c.bf16 %v386_v22, %v385_v21  ;;  %v377_v34 = vld [vmem:[#allocation8] sm:$0xff]  ;;  %v378_v35 = vld [vmem:[#allocation8 + $0x8] sm:$0xff] }
  0x57   :  { %587 = vmatprep.subr.bf16.mxu0 %v328_v63  ;;  %v223_v62 = vpack.c.bf16 %v208_v61, %v207_v60  ;;  %v205_v63 = vld [vmem:[%s1182_s6] sm:$0xff]  ;;  %v394_v40 = vpack.c.bf16 %v378_v35, %v377_v34 }
  0x58   :  { %631 = vmatpush3.bf16.msra.mxu1 %v224_v59  ;;  %v222_v2 = vpack.c.bf16 %v206_v1, %v205_v63  ;;  %v98_v59 = vld [vmem:[%s1177_s1] sm:$0xf]  ;;  %v550_v60 = vld [vmem:[%s1177_s1 + $0x4] sm:$0xf] }
  0x59   :  { %197 = vmatmul.mubr.bf16.vlgmr.msra.gmra.mxu0 %v139_v8  ;;  %632 = vmatprep.subr.bf16.mxu1 %v784_v0  ;;  %v101_v61 = vadd.f32 %v550_v60, %v98_v59 }
  0x5a   :  { %588 = vmatpush3.bf16.msra.mxu0 %v320_v9  ;;  %368 = vmatprep.mubr.bf16.mxu0 %v312_v10  ;;  %v391_v9 = vld [vmem:[#allocation8 + $0x70] sm:$0xff]  ;;  %v392_v10 = vld [vmem:[#allocation8 + $0x78] sm:$0xff] }
  0x5b   :  { %589 = vmatprep.subr.bf16.mxu0 %v327_v11  ;;  %v401_v13 = vpack.c.bf16 %v392_v10, %v391_v9 }
  0x5c   :  { %633 = vmatpush3.bf16.msra.mxu1 %v223_v62  ;;  %v102_v62 = vmul.f32 0.5, %v101_v61 }
  0x5d   :  { %634 = vmatprep.subr.bf16.mxu1 %v784_v0 }
  0x5e   :  { %590 = vmatpush3.bf16.msra.mxu0 %v319_v19  ;;  %v388_v19 = vld [vmem:[#allocation8 + $0x58] sm:$0xff] }
  0x5f   :  { %591 = vmatprep.subr.bf16.mxu0 %v326_v20  ;;  %v399_v20 = vpack.c.bf16 %v388_v19, %v387_v18 }
  0x60   :  { %635 = vmatpush3.bf16.msra.mxu1 %v222_v2 }
  0x61   :  { %640 = vmatprep.subr.bf16.mxu1 %v784_v0 }
  0x62   :  { %592 = vmatpush3.bf16.msra.mxu0 %v318_v26  ;;  %v397_v26 = vpack.c.bf16 %v384_v25, %v383_v24 }
  0x63   :  { %593 = vmatprep.subr.bf16.mxu0 %v325_v27  ;;  %v381_v27 = vld [vmem:[#allocation8 + $0x20] sm:$0xff] }
  0x64   :  { %v396_v29 = vpack.c.bf16 %v382_v28, %v381_v27 }
  0x66   :  { %594 = vmatpush3.bf16.msra.mxu0 %v317_v32 }
  0x67   :  { %595 = vmatprep.subr.bf16.mxu0 %v324_v33  ;;  %v395_v33 = vpack.c.bf16 %v380_v31, %v379_v30 }
  0x6a   :  { %596 = vmatpush3.bf16.msra.mxu0 %v316_v38 }
  0x6b   :  { %597 = vmatprep.subr.bf16.mxu0 %v323_v39 }
  0x6e   :  { %598 = vmatpush3.bf16.msra.mxu0 %v315_v44 }
  0x6f   :  { %599 = vmatprep.subr.bf16.mxu0 %v322_v45 }
  0x72   :  { %600 = vmatpush3.bf16.msra.mxu0 %v314_v50 }
  0x73   :  { %601 = vmatprep.subr.bf16.mxu0 %v321_v51 }
  0x76   :  { %602 = vmatpush3.bf16.msra.mxu0 %v313_v54 }
  0x77   :  { %660 = vmatprep.subr.bf16.mxu0 %v784_v0 }
  0x79   :  { %369 = vmatmul.mubr.bf16.vlgmr.msra.gmra.mxu0 %v311_v56 }
  0x7a   :  { %662 = vmatprep.mubr.msk.bf16.mxu0 %vm785_vm0, %v784_v0 }
 0x119   :  { %v572_v3 = vpop.f32.mrf.mxu0 }
 0x11b   :  { %v573_v5 = vpop.f32.mrf.mxu0 }
 0x11c   :  { %v574_v6 = vadd.f32 %v573_v5, %v572_v3 }
 0x11d   :  { %v575_v7 = vpop.f32.mrf.mxu0 }
 0x11e   :  { %v199_v8 = vadd.f32 %v574_v6, %v551_v4 }
 0x11f   :  { %v576_v11 = vpop.f32.mrf.mxu0 }
 0x120   :  { %v204_v12 = vmax.f32 %v199_v8, 0.0  ;;  %v495_v11 = vld [vmem:[%s1188_s12] sm:$0xf] }
 0x121   :  { %vm496_vm2 = vcmp.ne.f32.partialorder %v495_v11, 0.0 }
 0x122   :  { %v221_v14 = vpack.c.bf16 %v204_v12, %v204_v12  ;;  %v512_v12 = vstv %s555_s21 }
 0x124   :  { %637 = vmatmul.mubr.bf16.vlgmr.msra.gmra.mxu1 %v221_v14 }
 0x125   :  { %641 = vmatpush3.bf16.msra.mxu1 %v401_v13  ;;  %656 = vmatprep.mubr.msk.bf16.mxu1 %vm785_vm0, %v784_v0  ;;  %v497_v13 = vsel %vm496_vm2, 1.0, %v784_v0 }
 0x126   :  { %642 = vmatprep.subr.bf16.mxu1 %v784_v0  ;;  %v513_v15 = vmul.f32 %v512_v12, %v497_v13  ;;  %v509_v19 = vsub.f32 1.0, %v497_v13 }
 0x129   :  { %643 = vmatpush3.bf16.msra.mxu1 %v400_v17 }
 0x12a   :  { %644 = vmatprep.subr.bf16.mxu1 %v784_v0 }
 0x12d   :  { %645 = vmatpush3.bf16.msra.mxu1 %v399_v20  ;;  %v514_v20 = vadd.f32 1.0, %v513_v15 }
 0x12e   :  { %646 = vmatprep.subr.bf16.mxu1 %v784_v0 }
 0x131   :  { %647 = vmatpush3.bf16.msra.mxu1 %v398_v23 }
 0x132   :  { %648 = vmatprep.subr.bf16.mxu1 %v784_v0 }
 0x135   :  { %649 = vmatpush3.bf16.msra.mxu1 %v397_v26 }
 0x136   :  { %650 = vmatprep.subr.bf16.mxu1 %v784_v0 }
 0x139   :  { %v603_v32 = vpop.f32.mrf.mxu0  ;;  %651 = vmatpush3.bf16.msra.mxu1 %v396_v29 }
 0x13a   :  { %652 = vmatprep.subr.bf16.mxu1 %v784_v0 }
 0x13b   :  { %v604_v37 = vpop.f32.mrf.mxu0 }
 0x13c   :  { %v605_v38 = vadd.f32 %v604_v37, %v603_v32 }
 0x13d   :  { %v606_v39 = vpop.f32.mrf.mxu0  ;;  %653 = vmatpush3.bf16.msra.mxu1 %v395_v33 }
 0x13e   :  { %v371_v41 = vadd.f32 %v605_v38, %v553_v36  ;;  %654 = vmatprep.subr.bf16.mxu1 %v784_v0 }
 0x13f   :  { %v607_v42 = vpop.f32.mrf.mxu0 }
 0x140   :  { %v376_v43 = vmax.f32 %v371_v41, 0.0 }
 0x141   :  { %655 = vmatpush3.bf16.msra.mxu1 %v394_v40 }
 0x142   :  { %v393_v44 = vpack.c.bf16 %v376_v43, %v376_v43 }
 0x144   :  { %657 = vmatmul.mubr.bf16.vlgmr.msra.gmra.mxu1 %v393_v44 }
 0x1e4   :  { %v271_v45 = vpop.f32.mrf.mxu1 }
 0x1e5   :  { %v272_v56 = vadd.f32 %v552_v53, %v271_v45 }
 0x1e6   :  { %v638_v46 = vpop.f32.mrf.mxu1 }
 0x1e7   :  { %v449_v58 = vpack.c.bf16 %v272_v56, %v272_v56 }
 0x1e8   :  { %v274_v47 = vpop.f32.mrf.mxu1 }
 0x1ea   :  { %v639_v48 = vpop.f32.mrf.mxu1 }
 0x204   :  { %v443_v50 = vpop.f32.mrf.mxu1 }
 0x205   :  { %v444_v51 = vadd.f32 %v554_v49, %v443_v50 }
 0x206   :  { %v658_v52 = vpop.f32.mrf.mxu1 }
 0x207   :  { %v450_v54 = vpack.c.bf16 %v444_v51, %v444_v51 }
 0x208   :  { %v446_v55 = vpop.f32.mrf.mxu1 }
 0x209   :  { %661 = vmatpush3.bf16.xpose.msra.mxu0 %v450_v54 }
 0x20a   :  { %v659_v57 = vpop.f32.mrf.mxu1 }
 0x210   :  { %663 = vmatmul.mubr.bf16.vlgmr.msra.gmra.mxu0 %v449_v58 }
 0x2d0   :  { %v485_v63 = vpop.f32.mrf.mxu0 }
 0x2d1   :  { %v491_v1 = vadd.f32 %v485_v63, %v102_v62 }
 0x2d2   :  { %v664_v2 = vpop.f32.mrf.mxu0 }
 0x2d3   :  { %v492_v3 = vmul.f32 0.5, %v491_v1 }
 0x2d4   :  { %v488_v4 = vpop.f32.mrf.mxu0 }
 0x2d5   :  { %v501_v5 = vand.u32 2147483647, %v492_v3  ;;  %494 = vst.msk [vmem:[%s1189_s13] sm:$0xf] %vm493_vm1, %v492_v3  ;;  %v499_v14 = vsub.f32 0.0, %v492_v3  ;;  %v510_v22 = vmul.f32 %v509_v19, %v492_v3  ;;  %s786_s13 = smov [#allocation11]  }
 0x2d6   :  { %v665_v6 = vpop.f32.mrf.mxu0 }
 0x2d7   :  { %v502_v7 = vsub.f32 0.0, %v501_v5  ;;  %v500_v17 = vmax.f32 %v499_v14, 0.0 }
 0x2d9   :  { %v503_v8 = vmul.f32 1.442695, %v502_v7 }
 0x2db   :  { %678 = vpow2.f32 %v503_v8 }
 0x2e8   :  { %v679_v9 = vpop.eup %678 }
 0x2e9   :  { %v505_v10 = vadd.f32 1.0, %v679_v9 }
 0x2eb   :  { %680 = vlog2.f32 %v505_v10 }
 0x2f8   :  { %v681_v16 = vpop.eup %680 }
 0x2f9   :  { %v507_v18 = vmul.f32 0.6931472, %v681_v16 }
 0x2fb   :  { %v508_v21 = vadd.f32 %v507_v18, %v500_v17 }
 0x2fd   :  { %v515_v23 = vmul.f32 %v514_v20, %v508_v21 }
 0x2ff   :  { %v516_v24 = vadd.f32 %v515_v23, %v510_v22 }
 0x301   :  { %v517_v25 = vsel %vm493_vm1, %v516_v24, 0.0 }
 0x302   :  { %518 = vadd.xlane.f32.xlu0 %v517_v25 }
 0x38b   :  { %v519_v26 = vpop.xlane.xlu0 %518 }
 0x38c   :  { %v520_v27 = vrot.slane %v519_v26, 4 }
 0x38e   :  { %v521_v28 = vadd.f32 %v520_v27, %v519_v26 }
 0x390   :  { %v522_v29 = vrot.slane %v521_v28, 2 }
 0x392   :  { %v523_v30 = vadd.f32 %v522_v29, %v521_v28 }
 0x394   :  { %v524_v0 = vrot.slane %v523_v30, 1 }
 0x396   :  { %v525_v31 = vadd.f32 %v524_v0, %v523_v30 }
 0x398   :  { %666 = vpush %v525_v31 }
 0x3c9   :  { %s667_s0 = spop %666 }
 0x3ca   :  { %s527_s12 = smul.f32 0.03125, %s667_s0 }
 0x3cc   :  { %529 = sst [smem:[#allocation11]] %s527_s12 }
 0x3cd   :  { %539 = dma.smem_to_hbm %s786_s13, 16, %s1190_s14, [#allocation5]  }
 0x3ce   :  { %776 = dma.done.wait [#allocation5], 16  }
 0x3cf   :  { %777 = vsyncadd [#allocation5], 4294967280 }
 0x3d0   :  { %545 = sfence }
 0x3d1   :  { %546 = vsyncpa [#allocation4], 1 }
 0x3d2   :  { %547 = vsyncpa [#allocation7], 1 }
 0x3d3   :  { %548 = vsyncpa [#allocation10], 1 }
 0x3d4   :  { %549 = vsyncpa [#allocation5], 1 }

// kernel: _forward_core.2
= control target key start
LH: loop header
LB: loop body
LE: loop exit
PB: predicated region body
PF: predicated region fallthrough
CT: control target
= control target key end

     0   :  { %s2914_s0 = inlined_call_operand.vmem [shape: f32[2,3], index: 0, kind: input, shape index: {}]   ;;  %s2915_s1 = inlined_call_operand.vmem [shape: f32[2,16,16], index: 1, kind: input, shape index: {}]   ;;  %s2916_s2 = inlined_call_operand.hbm [shape: f32[2,16,16], index: 2, kind: input, shape index: {}]   ;;  %s2917_s3 = inlined_call_operand.vmem [shape: f32[4,16], index: 3, kind: input, shape index: {}]   ;;  %s2918_s4 = inlined_call_operand.hbm [shape: f32[2,16,128], index: 4, kind: input, shape index: {}]   ;;  %s2919_s5 = inlined_call_operand.vmem [shape: f32[2,1,128], index: 5, kind: input, shape index: {}]   ;;  %s2920_s6 = inlined_call_operand.vmem [shape: f32[2,1,128], index: 6, kind: input, shape index: {}]   ;;  %s2921_s7 = inlined_call_operand.vmem [shape: f32[2,1,128], index: 7, kind: input, shape index: {}]   ;;  %s2922_s8 = inlined_call_operand.hbm [shape: f32[2,128,128], index: 8, kind: input, shape index: {}]   ;;  %s2923_s9 = inlined_call_operand.vmem [shape: f32[2,1,128], index: 9, kind: input, shape index: {}]   ;;  %s2924_s10 = inlined_call_operand.vmem [shape: f32[2,1,128], index: 10, kind: input, shape index: {}]   ;;  %s2925_s11 = inlined_call_operand.vmem [shape: f32[2,1,128], index: 11, kind: input, shape index: {}]   ;;  %s2926_s12 = inlined_call_operand.hbm [shape: f32[2,128,128], index: 12, kind: input, shape index: {}]   ;;  %s2927_s13 = inlined_call_operand.hbm [shape: f32[2,1,128], index: 13, kind: input, shape index: {}]   ;;  %s2928_s14 = inlined_call_operand.vmem [shape: f32[2,1,128], index: 14, kind: input, shape index: {}]   ;;  %s2929_s15 = inlined_call_operand.hbm [shape: f32[2,1,128], index: 15, kind: input, shape index: {}]   ;;  %s2930_s16 = inlined_call_operand.vmem [shape: f32[4,256], index: 16, kind: output, shape index: {0}]   ;;  %s2931_s17 = inlined_call_operand.vmem [shape: f32[8,256], index: 17, kind: output, shape index: {1}]   ;;  %s2932_s18 = inlined_call_operand.vmem [shape: f32[2,4,8], index: 18, kind: output, shape index: {2}]  }
   0x1   :  { %2947 = sst [smem:[#allocation22_spill]] %s2914_s0 }
   0x2   :  { %2948 = sst [smem:[#allocation23_spill]] %s2915_s1 }
   0x3   :  { %2949 = sst [smem:[#allocation24_spill]] %s2916_s2 }
   0x4   :  { %2950 = sst [smem:[#allocation25_spill]] %s2917_s3 }
   0x5   :  { %2951 = sst [smem:[#allocation26_spill]] %s2918_s4 }
   0x6   :  { %2952 = sst [smem:[#allocation27_spill]] %s2921_s7 }
   0x7   :  { %2953 = sst [smem:[#allocation28_spill]] %s2922_s8 }
   0x8   :  { %2954 = sst [smem:[#allocation29_spill]] %s2923_s9 }
   0x9   :  { %2955 = sst [smem:[#allocation30_spill]] %s2924_s10 }
   0xa   :  { %2956 = sst [smem:[#allocation31_spill]] %s2925_s11 }
   0xb   :  { %2957 = sst [smem:[#allocation32_spill]] %s2926_s12 }
   0xc   :  { %2958 = sst [smem:[#allocation33_spill]] %s2928_s14 }
   0xd   :  { %2959 = sst [smem:[#allocation34_spill]] %s2930_s16 }
   0xe   :  { %2960 = sst [smem:[#allocation35_spill]] %s2931_s17 }
   0xf   :  { %2961 = sst [smem:[#allocation36_spill]] %s2932_s18 }
  0x10   :  { %24 = vsyncpa [#allocation4], 0 }
  0x11   :  { %25 = vsyncpa [#allocation3], 0 }
  0x12   :  { %27 = vsyncpa [#allocation3 + $0x1], 0 }
  0x13   :  { %28 = vsyncpa [#allocation7], 0 }
  0x14   :  { %30 = vsyncpa [#allocation7 + $0x1], 0 }
  0x15   :  { %31 = vsyncpa [#allocation10], 0 }
  0x16   :  { %33 = vsyncpa [#allocation10 + $0x1], 0 }
  0x17   :  { %34 = vsyncpa [#allocation13], 0 }
  0x18   :  { %36 = vsyncpa [#allocation13 + $0x1], 0  ;;  %s2440_s27 = smov 0   ;;  %s2442_s28 = smov 0  }
  0x19   :  { %s2444_s29 = smov 0   ;;  %s2446_s30 = smov 0  }
  0x1a LB: > { %2962 = sst [smem:[#allocation19_spill]] %s2328_s29  ;;  %s2461_s0 = sadd.s32 1, %s2332_s30   ;;  %s2332_s30 = sphi %s2446_s30, %s2998_s30   ;;  %s2328_s29 = sphi %s2444_s29, %s3000_s29   ;;  %s2324_s28 = sphi %s2442_s28, %s3002_s28   ;;  %s2320_s27 = sphi %s2440_s27, %s3001_s27  }
  0x1b   : > { %2963 = sst [smem:[#allocation20_spill]] %s2461_s0  ;;  %s96_s19 = sadd.s32 1, %s2328_s29 }
  0x1c   : > { %s93_s1 = ssub.s32 %s2332_s30, %s2461_s0  ;;  %p103_p0 = scmp.ne.s32.totalorder %s2328_s29, %s2324_s28 }
  0x1d   : > { %p94_p1 = scmp.eq.s32.totalorder %s93_s1, 0  ;;  %p104_p2 = scmp.eq.s32.totalorder %s2332_s30, 0 }
  0x1e   : > { %p2048_p3 = scmp.lt.s32.totalorder %s2332_s30, 2  ;;  %s2474_s21 = sand.u32 1, %s2328_s29  }
  0x1f   : > { %s2471_s20 = scalar_select %p94_p1, %s2328_s29, %s96_s19  }
  0x20   : > { %p105_p4 = por %p104_p2, %p103_p0  ;;  %s2937_s22 = sshll.u32 %s2474_s21, 4 }
  0x21   : > { %2964 = sst [smem:[#allocation21_spill]] %s2471_s20  ;;  %s2938_s2 = sshll.u32 %s2332_s30, 8 }
  0x22   : > { %p2478_p5 = pnand %p2048_p3, %p105_p4  ;;  %s2939_s24 = sand.u32 1, %s2332_s30  }
  0x23   : > { %s2966_s4 = sld [smem:[#allocation26_spill]]  ;;  %s591_s1 = scalar_lea.vmem [#allocation6], %s2937_s22 }
  0x24   : > { %s598_s20 = sshll.u32 %s591_s1, 4  ;;  %s2497_s0 = scalar_lea.sflag [#allocation7], %s2939_s24  ;;  %s2493_s20 = int_to_ptr.vmem [resolvable:$true] %s598_s20 }
  0x25   : > { %p2503_p7 = pneg %p2478_p5 }
  0x29   : > { %s2488_s19 = scalar_lea.hbm %s2966_s4, %s2938_s2  ;;  %s2104_s1 = scalar_lea.hbm %s2966_s4, 512 }
  0x2a   : > { %s2099_s18 = scalar_lea.hbm %s2488_s19, 256  ;;  %p2105_p10 = scmp.lt.s32.totalorder %s2488_s19, %s2966_s4 }
  0x2b   : > { %p2100_p6 = scmp.ne.s32.totalorder %s2488_s19, %s2099_s18  ;;  %p2106_p11 = scmp.lt.s32.totalorder %s2104_s1, %s2099_s18 }
  0x2d   : > { %p2102_p8 = pnand %p2503_p7, %p2100_p6  ;;  %p2107_p12 = por %p2106_p11, %p2105_p10 }
  0x2f   : > { %p2103_p9 = pneg %p2102_p8 }
  0x31   : > { %p2108_p13 = pnand %p2107_p12, %p2103_p9 }
  0x33   : > { %2111 = shalt.err (!%p2108_p13)
}
  0x34   : > { %s2112_s24 = scalar_lea.vmem %s2493_s20, 256  ;;  %s2334_s29 = smov [#allocation6]  }
  0x35   : > { %p2113_p0 = scmp.ne.s32.totalorder %s2493_s20, %s2112_s24  ;;  %s2117_s25 = sshll.u32 %s2334_s29, 4  ;;  %s2118_s25 = int_to_ptr.vmem [resolvable:$false] %s2117_s25 }
  0x36   : > { %s2119_s26 = scalar_lea.vmem %s2118_s25, 512  ;;  %p2120_p3 = scmp.lt.s32.totalorder %s2493_s20, %s2118_s25 }
  0x37   : > { %p2115_p1 = pnand %p2113_p0, %p2503_p7  ;;  %p2121_p4 = scmp.lt.s32.totalorder %s2119_s26, %s2112_s24 }
  0x39   : > { %p2116_p2 = pneg %p2115_p1  ;;  %p2122_p6 = por %p2121_p4, %p2120_p3 }
  0x3b   : > { %p2123_p8 = pnand %p2122_p6, %p2116_p2 }
  0x3d   : > { %2126 = shalt.err (!%p2123_p8)
}
  0x3e   : > { %s2940_s18 = smov 128   ;;  %s2942_s22 = smov 8  }
  0x3f   : > { %2034 = dma.hbm_to_vmem [thread:$0]  (!%p2478_p5), %s2488_s19, 256, %s2493_s20, %s2497_s0, %s2940_s18, %s2940_s18, %s2942_s22  }
  0x40   : > { %s1897_s29 = sshll.u32 %s2332_s30, 11  ;;  %s2968_s2 = sshll.u32 %s2474_s21, 7 }
  0x41   : > { %s630_s24 = scalar_lea.vmem [#allocation8], %s2968_s2  ;;  %s2969_s8 = sld [smem:[#allocation28_spill]] }
  0x42   : > { %s637_s1 = sshll.u32 %s630_s24, 4  ;;  %s2970_s12 = sld [smem:[#allocation32_spill]]  ;;  %s2537_s1 = int_to_ptr.vmem [resolvable:$true] %s637_s1 }
  0x43   : > { %s2971_s11 = smov %s2968_s2  ;;  %s2972_s2 = sand.u32 1, %s2332_s30  }
  0x44   : > { %s669_s20 = scalar_lea.vmem [#allocation9], %s2971_s11  ;;  %s2550_s24 = scalar_lea.sflag [#allocation10], %s2972_s2 }
  0x45   : > { %s676_s19 = sshll.u32 %s669_s20, 4  ;;  %s2546_s19 = int_to_ptr.vmem [resolvable:$true] %s676_s19 }
  0x47   : > { %s2535_s4 = scalar_lea.hbm %s2969_s8, %s1897_s29 }
  0x48   : > { %s2542_s14 = scalar_lea.hbm %s2970_s12, %s1897_s29  ;;  %s2132_s17 = scalar_lea.hbm %s2970_s12, 4096 }
  0x49   : > { %s2127_s25 = scalar_lea.hbm %s2542_s14, 2048  ;;  %p2133_p12 = scmp.lt.s32.totalorder %s2542_s14, %s2970_s12 }
  0x4a   : > { %p2128_p9 = scmp.ne.s32.totalorder %s2542_s14, %s2127_s25  ;;  %p2134_p13 = scmp.lt.s32.totalorder %s2132_s17, %s2127_s25 }
  0x4c   : > { %p2130_p10 = pnand %p2128_p9, %p2503_p7  ;;  %p2135_p0 = por %p2134_p13, %p2133_p12 }
  0x4e   : > { %p2131_p11 = pneg %p2130_p10 }
  0x50   : > { %p2136_p1 = pnand %p2135_p0, %p2131_p11 }
  0x52   : > { %2139 = shalt.err (!%p2136_p1)
}
  0x53   : > { %s2140_s11 = scalar_lea.vmem %s2546_s19, 2048  ;;  %s2337_s20 = smov [#allocation9]  }
  0x54   : > { %p2141_p2 = scmp.ne.s32.totalorder %s2546_s19, %s2140_s11  ;;  %s2145_s2 = sshll.u32 %s2337_s20, 4  ;;  %s2146_s2 = int_to_ptr.vmem [resolvable:$false] %s2145_s2 }
  0x55   : > { %s2147_s26 = scalar_lea.vmem %s2146_s2, 4096  ;;  %p2148_p6 = scmp.lt.s32.totalorder %s2546_s19, %s2146_s2 }
  0x56   : > { %p2143_p3 = pnand %p2141_p2, %p2503_p7  ;;  %p2149_p8 = scmp.lt.s32.totalorder %s2147_s26, %s2140_s11 }
  0x58   : > { %p2144_p4 = pneg %p2143_p3  ;;  %p2150_p9 = por %p2149_p8, %p2148_p6 }
  0x5a   : > { %p2151_p10 = pnand %p2150_p9, %p2144_p4 }
  0x5c   : > { %2154 = shalt.err (!%p2151_p10)
}
  0x5d   : > { %s2973_s18 = smov 128   ;;  %s2577_s25 = sadd.s32 4294967295, %s2332_s30  }
  0x5e   : > { %2040 = dma.hbm_to_vmem [thread:$0]  (!%p2478_p5), %s2542_s14, 2048, %s2546_s19, %s2550_s24, %s2973_s18, %s2973_s18, %s2942_s22  }
  0x5f   : > { %p109_p11 = scmp.ne.s32.totalorder %s2324_s28, %s2320_s27  ;;  %p2944_p12 = scmp.eq.s32.totalorder %s2577_s25, 0 }
  0x60   : > { %p1850_p13 = scmp.ge.s32.totalorder %s2332_s30, 1  ;;  %p531_p0 = scmp.lt.s32.totalorder %s2332_s30, 3 }
  0x61   : > { %p2586_p1 = por %p2944_p12, %p109_p11  ;;  %s2976_s29 = sld [smem:[#allocation22_spill]] }
  0x62   : > { %p2590_p2 = pnand %p1850_p13, %p531_p0  ;;  %s2977_s27 = sshll.u32 %s2332_s30, 8 }
  0x63   : > { %s2974_s3 = scalar_select %p2586_p1, 1, 0 }
  0x64   : > { %s2975_s17 = scalar_select %p2590_p2, 1, 0 }
  0x65   : > { %p2024_p3 = pneg %p2590_p2  ;;  %s2978_s26 = sld [smem:[#allocation24_spill]] }
  0x66   : > { %s2980_s10 = sshll.u32 %s2474_s21, 4 }
  0x67   : > { %s544_s11 = sshll.u32 %s2976_s29, 4  ;;  %p2608_p4 = pnand %p2024_p3, %p2944_p12  ;;  %s545_s11 = int_to_ptr.vmem [resolvable:$true] %s544_s11 }
  0x68   : > { %s570_s9 = scalar_lea.vmem [#allocation5], %s2980_s10  ;;  %s2155_s29 = scalar_lea.vmem %s545_s11, 32 }
  0x69   : > { %s577_s14 = sshll.u32 %s570_s9, 4  ;;  %p2156_p6 = scmp.ne.s32.totalorder %s545_s11, %s2155_s29  ;;  %s2614_s14 = int_to_ptr.vmem [resolvable:$true] %s577_s14 }
  0x6a   : > { %p2157_p8 = pneg %p2608_p4  ;;  %p2163_p11 = scmp.lt.s32.totalorder %s545_s11, %s545_s11 }
  0x6b   : > { %s2604_s22 = scalar_lea.hbm %s2978_s26, %s2977_s27  ;;  %p2164_p13 = scmp.lt.s32.totalorder %s2155_s29, %s2155_s29 }
  0x6c   : > { %p2158_p9 = pnand %p2157_p8, %p2156_p6 }
  0x6d   : > { %p2165_p0 = por %p2164_p13, %p2163_p11 }
  0x6e   : > { %p2159_p10 = pneg %p2158_p9 }
  0x70   : > { %p2166_p3 = pnand %p2165_p0, %p2159_p10 }
  0x72   : > { %2169 = shalt.err (!%p2166_p3)
}
  0x73   : > { %s2338_s27 = smov [#allocation2]   ;;  %s567_s9 = scalar_lea.sflag [#allocation3], %s2474_s21 }
  0x74   : > { %2027 = dma.vmem_to_smem (!%p2608_p4), %s545_s11, 32, %s2338_s27, [#allocation4]  }
  0x75   : > { %s2170_s10 = scalar_lea.hbm %s2604_s22, 256  ;;  %s2175_s29 = scalar_lea.hbm %s2978_s26, 512 }
  0x76   : > { %p2171_p12 = scmp.ne.s32.totalorder %s2604_s22, %s2170_s10  ;;  %p2176_p9 = scmp.lt.s32.totalorder %s2604_s22, %s2978_s26 }
  0x77   : > { %p2177_p10 = scmp.lt.s32.totalorder %s2175_s29, %s2170_s10 }
  0x78   : > { %p2173_p6 = pnand %p2171_p12, %p2503_p7 }
  0x79   : > { %p2178_p11 = por %p2177_p10, %p2176_p9 }
  0x7a   : > { %p2174_p8 = pneg %p2173_p6 }
  0x7c   : > { %p2179_p13 = pnand %p2178_p11, %p2174_p8 }
  0x7e   : > { %2182 = shalt.err (!%p2179_p13)
}
  0x7f   : > { %s2183_s12 = scalar_lea.vmem %s2614_s14, 256  ;;  %s2339_s11 = smov [#allocation5]  }
  0x80   : > { %p2184_p4 = scmp.ne.s32.totalorder %s2614_s14, %s2183_s12  ;;  %s2188_s27 = sshll.u32 %s2339_s11, 4  ;;  %s2189_s27 = int_to_ptr.vmem [resolvable:$false] %s2188_s27 }
  0x81   : > { %s2190_s20 = scalar_lea.vmem %s2189_s27, 512  ;;  %p2191_p3 = scmp.lt.s32.totalorder %s2614_s14, %s2189_s27 }
  0x82   : > { %p2186_p12 = pnand %p2184_p4, %p2503_p7  ;;  %p2192_p6 = scmp.lt.s32.totalorder %s2190_s20, %s2183_s12 }
  0x84   : > { %p2187_p0 = pneg %p2186_p12  ;;  %p2193_p1 = por %p2192_p6, %p2191_p3 }
  0x86   : > { %p2194_p2 = pnand %p2193_p1, %p2187_p0 }
  0x88   : > { %2197 = shalt.err (!%p2194_p2)
}
  0x89   : > { %s2981_s7 = smov 8   ;;  %s2198_s19 = scalar_lea.hbm %s2535_s4, 2048 }
  0x8a   : > { %2031 = dma.hbm_to_vmem [thread:$0]  (!%p2478_p5), %s2604_s22, 256, %s2614_s14, %s567_s9, %s2973_s18, %s2973_s18, %s2981_s7  }
  0x8b   : > { %p2199_p8 = scmp.ne.s32.totalorder %s2535_s4, %s2198_s19  ;;  %s2203_s29 = scalar_lea.hbm %s2969_s8, 4096 }
  0x8c   : > { %p2204_p1 = scmp.lt.s32.totalorder %s2535_s4, %s2969_s8  ;;  %p2205_p2 = scmp.lt.s32.totalorder %s2203_s29, %s2198_s19 }
  0x8d   : > { %p2201_p9 = pnand %p2199_p8, %p2503_p7 }
  0x8e   : > { %p2206_p11 = por %p2205_p2, %p2204_p1 }
  0x8f   : > { %p2202_p10 = pneg %p2201_p9 }
  0x91   : > { %p2207_p13 = pnand %p2206_p11, %p2202_p10 }
  0x93   : > { %2210 = shalt.err (!%p2207_p13)
}
  0x94   : > { %s2211_s22 = scalar_lea.vmem %s2537_s1, 2048  ;;  %s2340_s14 = smov [#allocation8]  }
  0x95   : > { %p2212_p4 = scmp.ne.s32.totalorder %s2537_s1, %s2211_s22  ;;  %s2216_s9 = sshll.u32 %s2340_s14, 4  ;;  %s2217_s9 = int_to_ptr.vmem [resolvable:$false] %s2216_s9 }
  0x96   : > { %s2218_s27 = scalar_lea.vmem %s2217_s9, 4096  ;;  %p2219_p3 = scmp.lt.s32.totalorder %s2537_s1, %s2217_s9 }
  0x97   : > { %p2214_p12 = pnand %p2212_p4, %p2503_p7  ;;  %p2220_p6 = scmp.lt.s32.totalorder %s2218_s27, %s2211_s22 }
  0x99   : > { %p2215_p0 = pneg %p2214_p12  ;;  %p2221_p8 = por %p2220_p6, %p2219_p3 }
  0x9b   : > { %p2222_p9 = pnand %p2221_p8, %p2215_p0 }
  0x9d   : > { %2225 = shalt.err (!%p2222_p9)
}
  0x9e   : > { %2037 = dma.hbm_to_vmem [thread:$0]  (!%p2478_p5), %s2535_s4, 2048, %s2537_s1, %s2497_s0, %s2973_s18, %s2973_s18, %s2981_s7  }
  0x9f   : > { %s2982_s20 = sshll.u32 %s2332_s30, 4  ;;  %s689_s29 = scalar_lea.vmem [#allocation11], %s2474_s21 }
  0xa0   : > { %s694_s2 = scalar_lea.hbm %s2927_s13, %s2982_s20  ;;  %s696_s12 = sshll.u32 %s689_s29, 4  ;;  %s697_s12 = int_to_ptr.vmem [resolvable:$true] %s696_s12 }
  0xa1   : > { %s2226_s11 = scalar_lea.hbm %s694_s2, 16  ;;  %s2231_s9 = scalar_lea.hbm %s2927_s13, 32 }
  0xa2   : > { %p2227_p10 = scmp.ne.s32.totalorder %s694_s2, %s2226_s11  ;;  %p2232_p11 = scmp.lt.s32.totalorder %s694_s2, %s2927_s13 }
  0xa3   : > { %p2233_p13 = scmp.lt.s32.totalorder %s2231_s9, %s2226_s11 }
  0xa4   : > { %p2229_p1 = pnand %p2227_p10, %p2503_p7 }
  0xa5   : > { %p2234_p4 = por %p2233_p13, %p2232_p11 }
  0xa6   : > { %p2230_p2 = pneg %p2229_p1 }
  0xa8   : > { %p2235_p12 = pnand %p2234_p4, %p2230_p2 }
  0xaa   : > { %2238 = shalt.err (!%p2235_p12)
}
  0xab   : > { %s2239_s4 = scalar_lea.vmem %s697_s12, 16  ;;  %s2341_s0 = smov [#allocation11]  }
  0xac   : > { %p2240_p0 = scmp.ne.s32.totalorder %s697_s12, %s2239_s4  ;;  %s2244_s1 = sshll.u32 %s2341_s0, 4  ;;  %s2245_s1 = int_to_ptr.vmem [resolvable:$false] %s2244_s1 }
  0xad   : > { %s2246_s18 = scalar_lea.vmem %s2245_s1, 32  ;;  %p2247_p8 = scmp.lt.s32.totalorder %s697_s12, %s2245_s1 }
  0xae   : > { %p2242_p3 = pnand %p2240_p0, %p2503_p7  ;;  %p2248_p9 = scmp.lt.s32.totalorder %s2246_s18, %s2239_s4 }
  0xb0   : > { %p2243_p6 = pneg %p2242_p3  ;;  %p2249_p10 = por %p2248_p9, %p2247_p8 }
  0xb2   : > { %p2250_p1 = pnand %p2249_p10, %p2243_p6 }
  0xb4   : > { %2253 = shalt.err (!%p2250_p1)
}
  0xb5   : > { %2043 = dma.hbm_to_vmem [thread:$0]  (!%p2478_p5), %s694_s2, 16, %s697_s12, %s2550_s24  }
  0xb6   : > { %s2983_s8 = smov %s2982_s20  ;;  %s712_s10 = scalar_lea.vmem [#allocation12], %s2474_s21 }
  0xb7   : > { %s2693_s19 = scalar_lea.hbm %s2929_s15, %s2983_s8  ;;  %s719_s29 = sshll.u32 %s712_s10, 4  ;;  %s720_s29 = int_to_ptr.vmem [resolvable:$true] %s719_s29 }
  0xb8   : > { %s710_s11 = scalar_lea.sflag [#allocation13], %s2474_s21  ;;  %s2254_s22 = scalar_lea.hbm %s2693_s19, 16 }
  0xb9   : > { %p2255_p2 = scmp.ne.s32.totalorder %s2693_s19, %s2254_s22  ;;  %s2259_s30 = scalar_lea.hbm %s2929_s15, 32 }
  0xba   : > { %p2260_p4 = scmp.lt.s32.totalorder %s2693_s19, %s2929_s15  ;;  %p2261_p12 = scmp.lt.s32.totalorder %s2259_s30, %s2254_s22 }
  0xbb   : > { %p2257_p11 = pnand %p2255_p2, %p2503_p7 }
  0xbc   : > { %p2262_p0 = por %p2261_p12, %p2260_p4 }
  0xbd   : > { %p2258_p13 = pneg %p2257_p11 }
  0xbf   : > { %p2263_p3 = pnand %p2262_p0, %p2258_p13 }
  0xc1   : > { %2266 = shalt.err (!%p2263_p3)
}
  0xc2   : > { %s2267_s9 = scalar_lea.vmem %s720_s29, 16  ;;  %s2342_s21 = smov [#allocation12]  }
  0xc3   : > { %p2268_p6 = scmp.ne.s32.totalorder %s720_s29, %s2267_s9  ;;  %s2272_s27 = sshll.u32 %s2342_s21, 4  ;;  %s2273_s27 = int_to_ptr.vmem [resolvable:$false] %s2272_s27 }
  0xc4   : > { %s2274_s4 = scalar_lea.vmem %s2273_s27, 32  ;;  %p2275_p10 = scmp.lt.s32.totalorder %s720_s29, %s2273_s27 }
  0xc5   : > { %p2270_p8 = pnand %p2268_p6, %p2503_p7  ;;  %p2276_p1 = scmp.lt.s32.totalorder %s2274_s4, %s2267_s9 }
  0xc7   : > { %p2271_p9 = pneg %p2270_p8  ;;  %p2277_p2 = por %p2276_p1, %p2275_p10 }
  0xc9   : > { %p2278_p11 = pnand %p2277_p2, %p2271_p9 }
  0xcb   : > { %2281 = shalt.err (!%p2278_p11)
}
  0xcc   : > { %2046 = dma.hbm_to_vmem [thread:$0]  (!%p2478_p5), %s2693_s19, 16, %s720_s29, %s710_s11  }
  0xcd   : > { %p2984_p13 = scmp.ne.s32.totalorder %s2975_s17, 0 }
  0xce   : > { %p2985_p4 = scmp.eq.s32.totalorder (!%p2984_p13), %s2577_s25, 0 }
  0xcf   : > { %728 = sbr.rel (%p2984_p13) target bundleno = 2766 (0xace), region = 84 }
  0xd4   : > { %2299 = dma.done.wait (%p2985_p4), [#allocation4], 32   ;;  %p2986_p7 = pmov %p2985_p4 }
  0xd5   : > { %s2720_s16 = sand.u32 1, %s2324_s28   ;;  %p2987_p12 = scmp.ne.s32.totalorder %s2974_s3, 0 }
  0xd6   : > { %2301 = vsyncadd (%p2986_p7), [#allocation4], 4294967264  ;;  %s1869_s0 = sshll.u32 %s2720_s16, 4  ;;  %s735_s1 = scalar_lea.sflag [#allocation3], %s2720_s16 }
  0xd7   : > { %s738_s23 = scalar_lea.vmem [#allocation5], %s1869_s0 }
  0xd8   : > { %2303 = dma.done.wait (%p2987_p12), %s735_s1, 256  }
  0xd9   : > { %2305 = vsyncadd (%p2987_p12), %s735_s1, 4294967040  ;;  %s743_s17 = sand.u32 1, %s2577_s25   ;;  %s747_s8 = scalar_lea.vmem [#allocation6], %s1869_s0 }
  0xda   : > { %s744_s18 = scalar_lea.sflag [#allocation7], %s743_s17 }
  0xdb   : > { %2307 = dma.done.wait (%p2987_p12), %s744_s18, 2304  }
  0xdc   : > { %2309 = vsyncadd (%p2987_p12), %s744_s18, 4294964992  ;;  %s1871_s7 = sshll.u32 %s2720_s16, 7  ;;  %s762_s19 = scalar_lea.sflag [#allocation10], %s743_s17 }
  0xdd   : > { %s2734_s20 = scalar_lea.vmem [#allocation8], %s1871_s7  ;;  %s2736_s10 = scalar_lea.vmem [#allocation9], %s1871_s7 }
  0xde   : > { %2311 = dma.done.wait (%p2987_p12), %s762_s19, 2064  }
  0xdf   : > { %2313 = vsyncadd (%p2987_p12), %s762_s19, 4294965232  ;;  %s773_s29 = scalar_lea.vmem [#allocation11], %s2720_s16  ;;  %s779_s11 = scalar_lea.sflag [#allocation13], %s2720_s16 }
  0xe0   : > { %s781_s22 = scalar_lea.vmem [#allocation12], %s2720_s16 }
  0xe1   : > { %2315 = dma.done.wait (%p2987_p12), %s779_s11, 16  }
  0xe2   : > { %2317 = vsyncadd (%p2987_p12), %s779_s11, 4294967280 }
  0xe3   : > { %786 = sfence }
  0xe4   : > { %v935_v0 = vld [vmem:[%s747_s8] sm:$0xff]  ;;  %v936_v1 = vld [vmem:[%s747_s8 + $0x8] sm:$0xff]  ;;  %v2343_v3 = vmov 0.0   ;;  %vm2344_vm0 = vmmov 0   ;;  %vm946_vm1 = vcmask 130048   ;;  %p891_p5 = scmp.lt.s32.totalorder %s2577_s25, 1 }
  0xe5   : > { %v933_v2 = vld [vmem:[%s738_s23] sm:$0xff]  ;;  %1931 = vmatprep.subr.bf16.mxu0 %v2343_v3  ;;  %v938_v4 = vpack.c.bf16 %v936_v1, %v935_v0  ;;  %1933 = vmatprep.mubr.msk.bf16.mxu0 %vm2344_vm0, %v2343_v3  ;;  %v934_v5 = vld [vmem:[%s738_s23 + $0x8] sm:$0xff]  ;;  %s2988_s4 = sld [smem:[#allocation27_spill]]  ;;  %vm1530_vm2 = vcmask 60416  }
  0xe6   : > { %v937_v6 = vpack.c.bf16 %v934_v5, %v933_v2  ;;  %1937 = vmatprep.subr.bf16.mxu1 %v2343_v3  ;;  %1939 = vmatprep.mubr.msk.bf16.mxu1 %vm2344_vm0, %v2343_v3  ;;  %s2761_s3 = scalar_select %p891_p5, %s2577_s25, 1  ;;  %v1093_v22 = vld [vmem:[%s2734_s20 + $0x70] sm:$0xff]  ;;  %v1094_v23 = vld [vmem:[%s2734_s20 + $0x78] sm:$0xff]  ;;  %v1091_v24 = vld [vmem:[%s2734_s20 + $0x60] sm:$0xff] }
  0xe7   : > { %1932 = vmatpush3.bf16.msra.mxu0 %v938_v4  ;;  %v1103_v25 = vpack.c.bf16 %v1094_v23, %v1093_v22  ;;  %v1092_v26 = vld [vmem:[%s2734_s20 + $0x68] sm:$0xff]  ;;  %v1089_v28 = vld [vmem:[%s2734_s20 + $0x50] sm:$0xff]  ;;  %v1090_v29 = vld [vmem:[%s2734_s20 + $0x58] sm:$0xff]  ;;  %s2989_s18 = sld [smem:[#allocation23_spill]] }
  0xe8   : > { %1943 = vmatprep.subr.bf16.mxu0 %v2343_v3  ;;  %s898_s30 = scalar_lea.vmem %s2919_s5, %s2761_s3  ;;  %v1102_v27 = vpack.c.bf16 %v1092_v26, %v1091_v24  ;;  %v1101_v30 = vpack.c.bf16 %v1090_v29, %v1089_v28  ;;  %v1087_v31 = vld [vmem:[%s2734_s20 + $0x40] sm:$0xff]  ;;  %v1088_v32 = vld [vmem:[%s2734_s20 + $0x48] sm:$0xff]  ;;  %v1085_v34 = vld [vmem:[%s2734_s20 + $0x30] sm:$0xff]  ;;  %s901_s9 = scalar_lea.vmem %s2920_s6, %s2761_s3 }
  0xe9   : > { %v1878_v7 = vld [vmem:[%s898_s30] ss:$0 sm:$0xff]  ;;  %v1100_v33 = vpack.c.bf16 %v1088_v32, %v1087_v31  ;;  %v1086_v35 = vld [vmem:[%s2734_s20 + $0x38] sm:$0xff]  ;;  %v1084_v38 = vld [vmem:[%s2734_s20 + $0x28] sm:$0xff]  ;;  %s1899_s1 = sshll.u32 %s2761_s3, 4  ;;  %s2991_s30 = sld [smem:[#allocation30_spill]] }
  0xea   : > { %1934 = vmatmul.mubr.msk.bf16.vlgmr.msra.gmra.mxu0 %vm946_vm1, %v937_v6  ;;  %v1099_v36 = vpack.c.bf16 %v1086_v35, %v1085_v34  ;;  %v1083_v37 = vld [vmem:[%s2734_s20 + $0x20] sm:$0xff]  ;;  %v1081_v62 = vld [vmem:[%s2734_s20 + $0x10] sm:$0xff]  ;;  %v1082_v63 = vld [vmem:[%s2734_s20 + $0x18] sm:$0xff]  ;;  %s2992_s21 = sld [smem:[#allocation31_spill]] }
  0xeb   : > { %1959 = vmatprep.mubr.msk.bf16.mxu0 %vm2344_vm0, %v2343_v3  ;;  %1944 = vmatpush3.bf16.msra.mxu0 %v1103_v25  ;;  %v1098_v39 = vpack.c.bf16 %v1084_v38, %v1083_v37  ;;  %v1880_v47 = vld [vmem:[%s901_s9] ss:$0 sm:$0xff]  ;;  %s904_s0 = scalar_lea.vmem %s2988_s4, %s2761_s3  ;;  %v1097_v0 = vpack.c.bf16 %v1082_v63, %v1081_v62  ;;  %v1080_v2 = vld [vmem:[%s2734_s20 + $0x8] sm:$0xff]  ;;  %v1238_v63 = vld [vmem:[%s2736_s10 + $0x10] sm:$0xff]  ;;  %s2860_s4 = sshll.u32 %s2577_s25, 7 }
  0xec   : > { %1945 = vmatprep.subr.bf16.mxu0 %v2343_v3  ;;  %v1881_v51 = vld [vmem:[%s904_s0] ss:$0 sm:$0xff]  ;;  %s1398_s0 = sadd.s32 1, %s2860_s4  ;;  %s2994_s19 = sld [smem:[#allocation35_spill]] }
  0xed   : > { %s895_s8 = scalar_lea.vmem %s2989_s18, %s1899_s1  ;;  %v1079_v1 = vld [vmem:[%s2734_s20] sm:$0xff]  ;;  %s2990_s20 = sld [smem:[#allocation29_spill]] }
  0xee   : > { %v930_v58 = vld [vmem:[%s895_s8] sm:$0xff]  ;;  %v931_v59 = vld [vmem:[%s895_s8 + $0x8] sm:$0xff]  ;;  %v1096_v4 = vpack.c.bf16 %v1080_v2, %v1079_v1  ;;  %s1394_s1 = sld [smem:[#allocation2 + %s2860_s4]]  ;;  %s1405_s18 = sadd.s32 2, %s2860_s4 }
  0xef   : > { %1946 = vmatpush3.bf16.msra.mxu0 %v1102_v27  ;;  %v2797_v61 = vpack.c.bf16 %v931_v59, %v930_v58  ;;  %s910_s2 = scalar_lea.vmem %s2991_s30, %s2761_s3  ;;  %v1240_v59 = vld [vmem:[%s2736_s10 + $0x20] sm:$0xff]  ;;  %s1399_s23 = sld [smem:[#allocation2 + %s1398_s0]] }
  0xf0   : > { %1947 = vmatprep.subr.bf16.mxu0 %v2343_v3  ;;  %v1884_v32 = vld [vmem:[%s910_s2] ss:$0 sm:$0xff]  ;;  %s913_s27 = scalar_lea.vmem %s2992_s21, %s2761_s3  ;;  %s1406_s16 = sld [smem:[#allocation2 + %s1405_s18]] }
  0xf1   : > { %v1236_v2 = vld [vmem:[%s2736_s10] sm:$0xff]  ;;  %s2995_s24 = sld [smem:[#allocation25_spill]]  ;;  %s1875_s30 = sshll.u32 %s2761_s3, 2 }
  0xf2   : > { %s2996_s9 = sld [smem:[#allocation34_spill]] }
  0xf3   : > { %1948 = vmatpush3.bf16.msra.mxu0 %v1101_v30  ;;  %s907_s11 = scalar_lea.vmem %s2990_s20, %s2761_s3  ;;  %s2997_s0 = sld [smem:[#allocation36_spill]] }
  0xf4   : > { %1949 = vmatprep.subr.bf16.mxu0 %v2343_v3 }
  0xf7   : > { %1950 = vmatpush3.bf16.msra.mxu0 %v1100_v33 }
  0xf8   : > { %1951 = vmatprep.subr.bf16.mxu0 %v2343_v3  ;;  %s920_s21 = scalar_lea.vmem %s2996_s9, %s1875_s30 }
  0xfb   : > { %1952 = vmatpush3.bf16.msra.mxu0 %v1099_v36  ;;  %v1885_v36 = vld [vmem:[%s913_s27] ss:$0 sm:$0xff] }
  0xfc   : > { %1953 = vmatprep.subr.bf16.mxu0 %v2343_v3 }
  0xff   : > { %1954 = vmatpush3.bf16.msra.mxu0 %v1098_v39 }
 0x100   : > { %1955 = vmatprep.subr.bf16.mxu0 %v2343_v3 }
 0x103   : > { %1956 = vmatpush3.bf16.msra.mxu0 %v1097_v0  ;;  %v1239_v0 = vld [vmem:[%s2736_s10 + $0x18] sm:$0xff] }
 0x104   : > { %1957 = vmatprep.subr.bf16.mxu0 %v2343_v3  ;;  %v1254_v1 = vpack.c.bf16 %v1239_v0, %v1238_v63  ;;  %v1412_v63 = vld [vmem:[%s2995_s24] sm:$0xf] }
 0x107   : > { %1958 = vmatpush3.bf16.msra.mxu0 %v1096_v4  ;;  %v1237_v4 = vld [vmem:[%s2736_s10 + $0x8] sm:$0xff] }
 0x108   : > { %1989 = vmatprep.subr.bf16.mxu0 %v2343_v3 }
 0x1aa   : > { %v984_v8 = vpop.f32.mrf.mxu0 }
 0x1ab   : > { %v985_v9 = vadd.f32 %v1878_v7, %v984_v8 }
 0x1ac   : > { %v1935_v10 = vpop.f32.mrf.mxu0 }
 0x1ad   : > { %991 = vadd.xlane.f32.xlu0 %v985_v9  ;;  %v1883_v10 = vld [vmem:[%s907_s11] ss:$0 sm:$0xff] }
 0x1ae   : > { %v987_v11 = vpop.f32.mrf.mxu0 }
 0x1af   : > { %v988_v12 = vadd.f32 %v1878_v7, %v987_v11 }
 0x1b0   : > { %v1936_v13 = vpop.f32.mrf.mxu0 }
 0x1b1   : > { %993 = vadd.xlane.f32.xlu0 %v988_v12 }
 0x236   : > { %v992_v14 = vpop.xlane.xlu0 %991 }
 0x237   : > { %v996_v15 = vmul.f32 0.0078125, %v992_v14 }
 0x239   : > { %v998_v16 = vsub.f32 %v985_v9, %v996_v15 }
 0x23a   : > { %v994_v17 = vpop.xlane.xlu0 %993 }
 0x23b   : > { %v997_v18 = vmul.f32 0.0078125, %v994_v17  ;;  %v1000_v19 = vmul.f32 %v998_v16, %v998_v16 }
 0x23d   : > { %v999_v20 = vsub.f32 %v988_v12, %v997_v18  ;;  %1002 = vadd.xlane.f32.xlu1 %v1000_v19 }
 0x23f   : > { %v1001_v21 = vmul.f32 %v999_v20, %v999_v20 }
 0x241   : > { %1004 = vadd.xlane.f32.xlu1 %v1001_v21 }
 0x2c6   : > { %v1003_v40 = vpop.xlane.xlu1 %1002 }
 0x2c7   : > { %v1006_v41 = vmul.f32 0.0078125, %v1003_v40 }
 0x2c9   : > { %v1008_v42 = vadd.f32 1e-05, %v1006_v41 }
 0x2ca   : > { %v1005_v43 = vpop.xlane.xlu1 %1004 }
 0x2cb   : > { %2087 = vrsqrt.f32 %v1008_v42  ;;  %v1007_v44 = vmul.f32 0.0078125, %v1005_v43  ;;  %v1250_v43 = vld [vmem:[%s2736_s10 + $0x70] sm:$0xff] }
 0x2cd   : > { %v1009_v45 = vadd.f32 1e-05, %v1007_v44  ;;  %v1251_v44 = vld [vmem:[%s2736_s10 + $0x78] sm:$0xff] }
 0x2cf   : > { %2089 = vrsqrt.f32 %v1009_v45 }
 0x2d8   : > { %v2088_v46 = vpop.eup %2087 }
 0x2d9   : > { %v1012_v48 = vmul.f32 %v2088_v46, %v998_v16  ;;  %v1260_v46 = vpack.c.bf16 %v1251_v44, %v1250_v43 }
 0x2db   : > { %v1021_v49 = vmul.f32 %v1880_v47, %v1012_v48  ;;  %v1249_v48 = vld [vmem:[%s2736_s10 + $0x68] sm:$0xff] }
 0x2dc   : > { %v2090_v50 = vpop.eup %2089 }
 0x2dd   : > { %v1013_v52 = vmul.f32 %v2090_v50, %v999_v20  ;;  %v1030_v54 = vadd.f32 %v1881_v51, %v1021_v49  ;;  %v1246_v50 = vld [vmem:[%s2736_s10 + $0x50] sm:$0xff] }
 0x2df   : > { %v1022_v53 = vmul.f32 %v1880_v47, %v1013_v52  ;;  %v1032_v56 = vmax.f32 %v1030_v54, 0.0  ;;  %v1248_v47 = vld [vmem:[%s2736_s10 + $0x60] sm:$0xff]  ;;  %v1245_v54 = vld [vmem:[%s2736_s10 + $0x48] sm:$0xff] }
 0x2e0   : > { %v1259_v49 = vpack.c.bf16 %v1249_v48, %v1248_v47 }
 0x2e1   : > { %v1031_v55 = vadd.f32 %v1881_v51, %v1022_v53  ;;  %v1247_v51 = vld [vmem:[%s2736_s10 + $0x58] sm:$0xff]  ;;  %v1244_v53 = vld [vmem:[%s2736_s10 + $0x40] sm:$0xff] }
 0x2e2   : > { %v1258_v52 = vpack.c.bf16 %v1247_v51, %v1246_v50 }
 0x2e3   : > { %v1033_v57 = vmax.f32 %v1031_v55, 0.0  ;;  %v1257_v55 = vpack.c.bf16 %v1245_v54, %v1244_v53  ;;  %v1407_v54 = vstv %s1406_s16 }
 0x2e5   : > { %v1034_v60 = vpack.c.bf16 %v1033_v57, %v1032_v56  ;;  %v1242_v56 = vld [vmem:[%s2736_s10 + $0x30] sm:$0xff]  ;;  %v1243_v57 = vld [vmem:[%s2736_s10 + $0x38] sm:$0xff] }
 0x2e6   : > { %v1256_v58 = vpack.c.bf16 %v1243_v57, %v1242_v56 }
 0x2e7   : > { %1938 = vmatpush3.bf16.msra.mxu1 %v1034_v60  ;;  %v1241_v60 = vld [vmem:[%s2736_s10 + $0x28] sm:$0xff] }
 0x2e8   : > { %1963 = vmatprep.subr.bf16.mxu1 %v2343_v3  ;;  %v1255_v62 = vpack.c.bf16 %v1241_v60, %v1240_v59 }
 0x2ea   : > { %1940 = vmatmul.mubr.msk.bf16.vlgmr.msra.gmra.mxu1 %vm946_vm1, %v2797_v61 }
 0x2eb   : > { %1965 = vmatprep.mubr.msk.bf16.mxu1 %vm2344_vm0, %v2343_v3 }
 0x3aa   : > { %v2810_v5 = vpop.f32.mrf.mxu1 }
 0x3ac   : > { %v1941_v6 = vpop.f32.mrf.mxu1 }
 0x3ad   : > { %v1253_v6 = vpack.c.bf16 %v1237_v4, %v1236_v2 }
 0x3ae   : > { %v2812_v7 = vpop.f32.mrf.mxu1 }
 0x3af   : > { %v1095_v8 = vpack.c.bf16 %v2812_v7, %v2810_v5 }
 0x3b0   : > { %v1942_v9 = vpop.f32.mrf.mxu1 }
 0x3b1   : > { %1960 = vmatmul.mubr.bf16.vlgmr.msra.gmra.mxu0 %v1095_v8  ;;  %v1395_v8 = vstv %s1394_s1  ;;  %v1400_v9 = vstv %s1399_s23  ;;  %s928_s1 = scalar_lea.vmem %s2997_s0, %s1875_s30 }
 0x3b2   : > { %1991 = vmatprep.mubr.msk.bf16.mxu0 %vm2344_vm0, %v2343_v3 }
 0x471   : > { %v1145_v11 = vpop.f32.mrf.mxu0 }
 0x472   : > { %v1146_v12 = vadd.f32 %v1883_v10, %v1145_v11  ;;  %v1396_v11 = vmul.f32 %v1395_v8, %v2810_v5 }
 0x473   : > { %v1961_v13 = vpop.f32.mrf.mxu0 }
 0x474   : > { %1152 = vadd.xlane.f32.xlu0 %v1146_v12 }
 0x475   : > { %v1148_v14 = vpop.f32.mrf.mxu0 }
 0x476   : > { %v1149_v15 = vadd.f32 %v1883_v10, %v1148_v14 }
 0x477   : > { %v1962_v16 = vpop.f32.mrf.mxu0 }
 0x478   : > { %1154 = vadd.xlane.f32.xlu1 %v1149_v15  ;;  %v1397_v16 = vmul.f32 %v1395_v8, %v2812_v7 }
 0x4fd   : > { %v1153_v17 = vpop.xlane.xlu0 %1152 }
 0x4fe   : > { %v1156_v18 = vmul.f32 0.0078125, %v1153_v17 }
 0x500   : > { %v1158_v19 = vsub.f32 %v1146_v12, %v1156_v18 }
 0x501   : > { %v1155_v20 = vpop.xlane.xlu1 %1154 }
 0x502   : > { %v1157_v21 = vmul.f32 0.0078125, %v1155_v20  ;;  %v1160_v22 = vmul.f32 %v1158_v19, %v1158_v19 }
 0x504   : > { %v1159_v23 = vsub.f32 %v1149_v15, %v1157_v21  ;;  %1162 = vadd.xlane.f32.xlu0 %v1160_v22  ;;  %v1887_v21 = vld [vmem:[%s773_s29] ss:$0 sm:$0xff]  ;;  %s2993_s29 = sld [smem:[#allocation33_spill]] }
 0x506   : > { %v1161_v24 = vmul.f32 %v1159_v23, %v1159_v23 }
 0x508   : > { %1164 = vadd.xlane.f32.xlu1 %v1161_v24 }
 0x50a   : > { %s916_s17 = scalar_lea.vmem %s2993_s29, %s2761_s3 }
 0x58d   : > { %v1163_v25 = vpop.xlane.xlu0 %1162 }
 0x58e   : > { %v1166_v26 = vmul.f32 0.0078125, %v1163_v25 }
 0x590   : > { %v1168_v27 = vadd.f32 1e-05, %v1166_v26 }
 0x591   : > { %v1165_v28 = vpop.xlane.xlu1 %1164 }
 0x592   : > { %2091 = vrsqrt.f32 %v1168_v27  ;;  %v1167_v29 = vmul.f32 0.0078125, %v1165_v28 }
 0x594   : > { %v1169_v30 = vadd.f32 1e-05, %v1167_v29 }
 0x596   : > { %2093 = vrsqrt.f32 %v1169_v30 }
 0x59f   : > { %v2092_v31 = vpop.eup %2091 }
 0x5a0   : > { %v1172_v33 = vmul.f32 %v2092_v31, %v1158_v19 }
 0x5a2   : > { %v1181_v34 = vmul.f32 %v1884_v32, %v1172_v33 }
 0x5a3   : > { %v2094_v35 = vpop.eup %2093 }
 0x5a4   : > { %v1173_v37 = vmul.f32 %v2094_v35, %v1159_v23  ;;  %v1190_v39 = vadd.f32 %v1885_v36, %v1181_v34 }
 0x5a6   : > { %v1182_v38 = vmul.f32 %v1884_v32, %v1173_v37  ;;  %v1192_v41 = vmax.f32 %v1190_v39, 0.0 }
 0x5a8   : > { %v1191_v40 = vadd.f32 %v1885_v36, %v1182_v38 }
 0x5aa   : > { %v1193_v42 = vmax.f32 %v1191_v40, 0.0 }
 0x5ac   : > { %v1194_v45 = vpack.c.bf16 %v1193_v42, %v1192_v41  ;;  %v1888_v41 = vld [vmem:[%s916_s17] ss:$0 sm:$0xff] }
 0x5ae   : > { %1964 = vmatpush3.bf16.msra.mxu1 %v1194_v45  ;;  %v1889_v45 = vld [vmem:[%s781_s22] ss:$0 sm:$0xff]  ;;  %s1876_s22 = sshll.u32 %s2761_s3, 3 }
 0x5af   : > { %1969 = vmatprep.subr.bf16.mxu1 %v2343_v3  ;;  %s924_s20 = scalar_lea.vmem %s2994_s19, %s1876_s22 }
 0x5b1   : > { %1966 = vmatmul.mubr.msk.bf16.vlgmr.msra.gmra.mxu1 %vm946_vm1, %v2797_v61 }
 0x5b2   : > { %1970 = vmatpush3.bf16.msra.mxu1 %v1260_v46  ;;  %1985 = vmatprep.mubr.msk.bf16.mxu1 %vm2344_vm0, %v2343_v3 }
 0x5b3   : > { %1971 = vmatprep.subr.bf16.mxu1 %v2343_v3 }
 0x5b6   : > { %1972 = vmatpush3.bf16.msra.mxu1 %v1259_v49 }
 0x5b7   : > { %1973 = vmatprep.subr.bf16.mxu1 %v2343_v3 }
 0x5ba   : > { %1974 = vmatpush3.bf16.msra.mxu1 %v1258_v52 }
 0x5bb   : > { %1975 = vmatprep.subr.bf16.mxu1 %v2343_v3 }
 0x5be   : > { %1976 = vmatpush3.bf16.msra.mxu1 %v1257_v55 }
 0x5bf   : > { %1977 = vmatprep.subr.bf16.mxu1 %v2343_v3 }
 0x5c2   : > { %1978 = vmatpush3.bf16.msra.mxu1 %v1256_v58 }
 0x5c3   : > { %1979 = vmatprep.subr.bf16.mxu1 %v2343_v3 }
 0x5c6   : > { %1980 = vmatpush3.bf16.msra.mxu1 %v1255_v62 }
 0x5c7   : > { %1981 = vmatprep.subr.bf16.mxu1 %v2343_v3 }
 0x5ca   : > { %1982 = vmatpush3.bf16.msra.mxu1 %v1254_v1 }
 0x5cb   : > { %1983 = vmatprep.subr.bf16.mxu1 %v2343_v3 }
 0x5ce   : > { %1984 = vmatpush3.bf16.msra.mxu1 %v1253_v6 }
 0x5cf   : > { %2002 = vmatprep.subr.bf16.mxu1 %v2343_v3 }
 0x671   : > { %v1229_v10 = vpop.f32.mrf.mxu1 }
 0x672   : > { %v1401_v12 = vmul.f32 %v1400_v9, %v1229_v10 }
 0x673   : > { %v1967_v13 = vpop.f32.mrf.mxu1 }
 0x674   : > { %v2865_v14 = vadd.f32 %v1401_v12, %v1396_v11 }
 0x675   : > { %v1232_v15 = vpop.f32.mrf.mxu1 }
 0x676   : > { %v1252_v17 = vpack.c.bf16 %v1232_v15, %v1229_v10  ;;  %v1402_v18 = vmul.f32 %v1400_v9, %v1232_v15 }
 0x677   : > { %v1968_v19 = vpop.f32.mrf.mxu1 }
 0x678   : > { %v1404_v20 = vadd.f32 %v1402_v18, %v1397_v16  ;;  %1986 = vmatmul.mubr.bf16.vlgmr.msra.gmra.mxu1 %v1252_v17 }
 0x679   : > { %2004 = vmatprep.mubr.msk.bf16.mxu1 %vm2344_vm0, %v2343_v3 }
 0x738   : > { %v1302_v22 = vpop.f32.mrf.mxu1 }
 0x739   : > { %v1303_v23 = vadd.f32 %v1887_v21, %v1302_v22 }
 0x73a   : > { %v1987_v5 = vpop.f32.mrf.mxu1 }
 0x73b   : > { %1309 = vadd.xlane.f32.xlu0 %v1303_v23 }
 0x73c   : > { %v1305_v24 = vpop.f32.mrf.mxu1 }
 0x73d   : > { %v1306_v25 = vadd.f32 %v1887_v21, %v1305_v24 }
 0x73e   : > { %v1988_v26 = vpop.f32.mrf.mxu1 }
 0x73f   : > { %1311 = vadd.xlane.f32.xlu1 %v1306_v25 }
 0x7c4   : > { %v1310_v27 = vpop.xlane.xlu0 %1309 }
 0x7c5   : > { %v1313_v7 = vmul.f32 0.0078125, %v1310_v27 }
 0x7c7   : > { %v1315_v28 = vsub.f32 %v1303_v23, %v1313_v7 }
 0x7c8   : > { %v1312_v29 = vpop.xlane.xlu1 %1311 }
 0x7c9   : > { %v1314_v30 = vmul.f32 0.0078125, %v1312_v29  ;;  %v1317_v31 = vmul.f32 %v1315_v28, %v1315_v28 }
 0x7cb   : > { %v1316_v32 = vsub.f32 %v1306_v25, %v1314_v30  ;;  %1319 = vadd.xlane.f32.xlu0 %v1317_v31 }
 0x7cd   : > { %v1318_v33 = vmul.f32 %v1316_v32, %v1316_v32 }
 0x7cf   : > { %1321 = vadd.xlane.f32.xlu1 %v1318_v33 }
 0x854   : > { %v1320_v34 = vpop.xlane.xlu0 %1319 }
 0x855   : > { %v1323_v35 = vmul.f32 0.0078125, %v1320_v34 }
 0x857   : > { %v1325_v36 = vadd.f32 1e-05, %v1323_v35 }
 0x858   : > { %v1322_v37 = vpop.xlane.xlu1 %1321 }
 0x859   : > { %2095 = vrsqrt.f32 %v1325_v36  ;;  %v1324_v38 = vmul.f32 0.0078125, %v1322_v37 }
 0x85b   : > { %v1326_v39 = vadd.f32 1e-05, %v1324_v38 }
 0x85d   : > { %2097 = vrsqrt.f32 %v1326_v39 }
 0x866   : > { %v2096_v40 = vpop.eup %2095 }
 0x867   : > { %v1329_v42 = vmul.f32 %v2096_v40, %v1315_v28 }
 0x869   : > { %v1338_v43 = vmul.f32 %v1888_v41, %v1329_v42 }
 0x86a   : > { %v2098_v44 = vpop.eup %2097 }
 0x86b   : > { %v1330_v46 = vmul.f32 %v2098_v44, %v1316_v32  ;;  %v1347_v48 = vadd.f32 %v1889_v45, %v1338_v43 }
 0x86d   : > { %v1339_v47 = vmul.f32 %v1888_v41, %v1330_v46  ;;  %v1349_v50 = vmax.f32 %v1347_v48, 0.0 }
 0x86f   : > { %v1348_v49 = vadd.f32 %v1889_v45, %v1339_v47 }
 0x871   : > { %v1350_v51 = vmax.f32 %v1348_v49, 0.0 }
 0x873   : > { %v1351_v52 = vpack.c.bf16 %v1350_v51, %v1349_v50 }
 0x875   : > { %1990 = vmatpush3.bf16.msra.mxu0 %v1351_v52 }
 0x876   : > { %1995 = vmatprep.subr.mxu0 %v2343_v3 }
 0x878   : > { %1992 = vmatmul.mubr.msk.bf16.vlgmr.msra.gmra.mxu0 %vm946_vm1, %v2797_v61 }
 0x879   : > { %1999 = vmatprep.mubr.msk.f32.mxu0 %vm2344_vm0, %v2343_v3 }
 0x938   : > { %v1386_v53 = vpop.f32.mrf.mxu0 }
 0x939   : > { %v1408_v57 = vmul.f32 %v1407_v54, %v1386_v53 }
 0x93a   : > { %v1993_v55 = vpop.f32.mrf.mxu0 }
 0x93b   : > { %v1410_v61 = vadd.f32 %v1408_v57, %v2865_v14 }
 0x93c   : > { %v1389_v56 = vpop.f32.mrf.mxu0 }
 0x93d   : > { %v1409_v58 = vmul.f32 %v1407_v54, %v1389_v56 }
 0x93e   : > { %v1994_v59 = vpop.f32.mrf.mxu0 }
 0x93f   : > { %v1411_v60 = vadd.f32 %v1409_v58, %v1404_v20 }
 0x941   : > { %1487 = vst [vmem:[%s924_s20] sm:$0xff] %v1411_v60  ;;  %v1489_v62 = vpack.c.bf16 %v1411_v60, %v1411_v60  ;;  %1996 = vmatpush3.msra.mxu0 %v1411_v60 }
 0x942   : > { %1997 = vmatprep.subr.mxu0 %v2343_v3 }
 0x943   : > { %1998 = vmatpush3.msra.mxu0 %v1410_v61  ;;  %2003 = vmatpush3.bf16.xpose.msra.mxu1 %v1489_v62 }
 0x944   : > { %2000 = vmatmul.mubr.msk.f32.vlgmr.msra.gmra.mxu0 %vm946_vm1, %v1412_v63 }
 0xa04   : > { %v1482_v0 = vpop.f32.mrf.mxu0 }
 0xa05   : > { %1486 = vst [vmem:[%s920_s21] sm:$0xf] %v1482_v0  ;;  %v1488_v1 = vpack.c.bf16 %v1482_v0, %v1482_v0 }
 0xa06   : > { %v2001_v2 = vpop.f32.mrf.mxu0 }
 0xa07   : > { %2005 = vmatmul.mubr.bf16.vlgmr.msra.gmra.mxu1 %v1488_v1 }
 0xac7   : > { %v1524_v3 = vpop.f32.mrf.mxu1 }
 0xac8   : > { %1531 = vst.msk [vmem:[%s928_s1] sm:$0xf] %vm1530_vm2, %v1524_v3 }
 0xac9   : > { %v2006_v4 = vpop.f32.mrf.mxu1 }
 0xacb   : > { %v1527_v6 = vpop.f32.mrf.mxu1 }
 0xacd   : > { %v2007_v8 = vpop.f32.mrf.mxu1 }
 0xace PF: > { %s2998_s30 = sld [smem:[#allocation20_spill]]  ;;  %s3001_s27 = smov %s2324_s28 }
 0xacf   : > { %s2999_s3 = sld [smem:[#allocation19_spill]] }
 0xad0   : > { %s3000_s29 = sld [smem:[#allocation21_spill]] }
 0xad4   : > { %p39_p0 = scmp.ge.s32.totalorder %s2998_s30, 4  }
 0xad5   : > { %s3002_s28 = smov %s2999_s3 }
 0xad6   :  { %41 = sbr.rel (!%p39_p0) target bundleno = 26 (0x1a), region = 238 }
 0xadb   :  { %1579 = vsyncpa [#allocation3], 1 }
 0xadc   :  { %1581 = vsyncpa [#allocation3 + $0x1], 1 }
 0xadd   :  { %1582 = vsyncpa [#allocation7], 1 }
 0xade   :  { %1584 = vsyncpa [#allocation7 + $0x1], 1 }
 0xadf   :  { %1585 = vsyncpa [#allocation10], 1 }
 0xae0   :  { %1587 = vsyncpa [#allocation10 + $0x1], 1 }
 0xae1   :  { %1588 = vsyncpa [#allocation13], 1 }
 0xae2   :  { %1590 = vsyncpa [#allocation13 + $0x1], 1 }
 0xae3   :  { %1591 = vsyncpa [#allocation4], 1 }
 0xae4   :  { %1593 = vsyncpa [#allocation4 + $0x1], 1 }

</bundles_post_ra>
